<compile_context>
chip_gen: v7x
topology: tpu7x:2x2x1
jax: 0.10.0
libtpu: 0.0.40
codegen_flags: <defaults>
</compile_context>

<pallas_src>
import functools
import math

import jax
import jax.numpy as jnp
from jax import lax
from jax.experimental import pallas as pl
from jax.experimental.pallas import tpu as pltpu

LANE = 128
_VMEM_LIMIT = 48 * 1024 * 1024        # scoped-VMEM cap; actual use is far lower
_RESIDENT_RHS_BYTES = 8 * 1024 * 1024  # keep resident RHS (x2 buffers) v7x-safe


def _round_up(a, b):
    return (a + b - 1) // b * b


def _pick_tile(dim, requested, granule=LANE):
    """Largest multiple-of-granule divisor of `dim` that is <= requested."""
    t = min(requested, dim)
    t = max((t // granule) * granule, granule)
    while dim % t:
        t -= granule
    return t


def _pad_cast(a, rows, cols, dtype):
    """Pad/cast only when needed (skips the extra HBM round trip otherwise)."""
    if a.shape == (rows, cols) and a.dtype == dtype:
        return a
    buf = jnp.zeros((rows, cols), dtype)
    return buf.at[: a.shape[0], : a.shape[1]].set(a.astype(dtype))


# --------------------- kernel 1: xw1 = x @ w1 (w1 resident) -----------------
def _xw1_kernel(x_ref, w1_ref, o_ref):
    o_ref[...] = jnp.dot(
        x_ref[...], w1_ref[...], preferred_element_type=jnp.float32
    ).astype(o_ref.dtype)


# ------------- kernel 2: hid = mat @ xw1, tiled (rows i, reduction k) -------
def _prop_kernel(mat_ref, rhs_ref, o_ref, acc_ref, *, tile_k, rhs_resident):
    k = pl.program_id(1)

    @pl.when(k == 0)
    def _():
        acc_ref[...] = jnp.zeros_like(acc_ref)

    if rhs_resident:
        start = pl.multiple_of(k * tile_k, tile_k)
        rhs = rhs_ref[pl.ds(start, tile_k), :]
    else:
        rhs = rhs_ref[...]

    acc_ref[...] += jnp.dot(
        mat_ref[...], rhs.astype(mat_ref.dtype),
        preferred_element_type=jnp.float32)

    @pl.when(k == pl.num_programs(1) - 1)
    def _():
        o_ref[...] = acc_ref[...].astype(o_ref.dtype)


# --- kernel 3: bef = mat @ hid; fused epilogue fin = bef @ w2, log_softmax ---
def _prop_classify_kernel(mat_ref, hid_ref, w2_ref,
                          bef_ref, fin_ref, out_ref,
                          *, tile_k, rhs_resident, num_classes):
    k = pl.program_id(1)

    # bef_ref (f32, constant block index across k) is the accumulator itself.
    @pl.when(k == 0)
    def _():
        bef_ref[...] = jnp.zeros_like(bef_ref)

    # TODO(synk): training-mode dropout on hid would use pltpu.prng_seed /
    # pltpu.prng_random_bits here; the module runs with training=False so
    # dropout is the identity.
    if rhs_resident:
        start = pl.multiple_of(k * tile_k, tile_k)
        rhs = hid_ref[pl.ds(start, tile_k), :]
    else:
        rhs = hid_ref[...]

    bef_ref[...] += jnp.dot(
        mat_ref[...], rhs.astype(mat_ref.dtype),
        preferred_element_type=jnp.float32)

    @pl.when(k == pl.num_programs(1) - 1)
    def _():
        bef = bef_ref[...]

        # Tiny classifier matmul in f32 (w2 is lane-padded and fully resident).
        fin = jnp.dot(bef, w2_ref[...], preferred_element_type=jnp.float32)
        fin_ref[...] = fin.astype(fin_ref.dtype)

        # log_softmax along the class axis, masking the lane padding.
        col = lax.broadcasted_iota(jnp.int32, fin.shape, 1)
        valid = col < num_classes
        masked = jnp.where(valid, fin, jnp.float32(-jnp.inf))
        m = jnp.max(masked, axis=1, keepdims=True)
        p = jnp.where(valid, jnp.exp(masked - m), jnp.float32(0.0))
        lse = jnp.log(jnp.sum(p, axis=1, keepdims=True))
        out_ref[...] = ((fin - m) - lse).astype(out_ref.dtype)


@functools.partial(
    jax.jit, static_argnames=("tile_m", "tile_k", "compute_dtype"))
def sgc_forward(mat, x, w1, w2, *, tile_m=256, tile_k=512,
                compute_dtype=jnp.bfloat16):
    N = mat.shape[0]
    F = x.shape[1]
    H = w1.shape[1]
    C = w2.shape[1]

    cdt = jnp.dtype(compute_dtype)

    # Independent lane-granule padding of N (never explodes for awkward N);
    # tiles are clamped to divisors of Np so the grid stays exact.
    Np = _round_up(N, LANE)
    Hp = _round_up(H, LANE)
    Cp = _round_up(C, LANE)
    tm = _pick_tile(Np, tile_m)
    tk = _pick_tile(Np, tile_k)
    n_row = Np // tm
    n_red = Np // tk

    # Keep the (Np, Hp) propagation RHS fully VMEM-resident when it fits.
    rhs_resident = Np * Hp * cdt.itemsize <= _RESIDENT_RHS_BYTES

    # Pad / cast only when necessary (mat is static in GNN workloads; callers
    # may pre-cast it to `compute_dtype` once outside the jit to avoid the
    # remaining N^2 cast on the bf16 path).
    mat_p = _pad_cast(mat, Np, Np, cdt)
    x_p = _pad_cast(x, Np, F, cdt)
    w1_p = _pad_cast(w1, F, Hp, cdt)
    w2_p = _pad_cast(w2, Hp, Cp, jnp.float32)

    params_1d = pltpu.CompilerParams(
        dimension_semantics=("parallel",), vmem_limit_bytes=_VMEM_LIMIT)
    params_2d = pltpu.CompilerParams(
        dimension_semantics=("parallel", "arbitrary"),
        vmem_limit_bytes=_VMEM_LIMIT)

    if rhs_resident:
        rhs_spec = pl.BlockSpec((Np, Hp), lambda i, k: (0, 0))
    else:
        rhs_spec = pl.BlockSpec((tk, Hp), lambda i, k: (k, 0))

    # (1) xw1 = x @ w1   (hoisted tiny matmul; w1 fully resident)
    xw1 = pl.pallas_call(
        _xw1_kernel,
        out_shape=jax.ShapeDtypeStruct((Np, Hp), cdt),
        grid_spec=pltpu.PrefetchScalarGridSpec(
            num_scalar_prefetch=0,
            grid=(n_row,),
            in_specs=[pl.BlockSpec((tm, F), lambda i: (i, 0)),
                      pl.BlockSpec((F, Hp), lambda i: (0, 0))],
            out_specs=pl.BlockSpec((tm, Hp), lambda i: (i, 0))),
        compiler_params=params_1d,
    )(x_p, w1_p)

    # (2) hid = mat @ xw1   (mat streamed in (tm, tk) blocks; RHS resident
    #     when it fits).  hid stored in compute dtype: pass 3 downcasts it
    #     before the MXU anyway, so f32 storage buys no accuracy.
    hid = pl.pallas_call(
        functools.partial(_prop_kernel, tile_k=tk, rhs_resident=rhs_resident),
        out_shape=jax.ShapeDtypeStruct((Np, Hp), cdt),
        grid_spec=pltpu.PrefetchScalarGridSpec(
            num_scalar_prefetch=0,
            grid=(n_row, n_red),
            in_specs=[pl.BlockSpec((tm, tk), lambda i, k: (i, k)),
                      rhs_spec],
            out_specs=pl.BlockSpec((tm, Hp), lambda i, k: (i, 0)),
            scratch_shapes=[pltpu.VMEM((tm, Hp), jnp.float32)]),
        compiler_params=params_2d,
    )(mat_p, xw1)

    # (3) bef = mat @ hid, accumulated directly in the f32 bef output block,
    #     with fused fin = bef @ w2 and log_softmax epilogue.
    bef, fin, out = pl.pallas_call(
        functools.partial(_prop_classify_kernel, tile_k=tk,
                          rhs_resident=rhs_resident, num_classes=C),
        out_shape=(jax.ShapeDtypeStruct((Np, Hp), jnp.float32),
                   jax.ShapeDtypeStruct((Np, Cp), jnp.float32),
                   jax.ShapeDtypeStruct((Np, Cp), jnp.float32)),
        grid_spec=pltpu.PrefetchScalarGridSpec(
            num_scalar_prefetch=0,
            grid=(n_row, n_red),
            in_specs=[pl.BlockSpec((tm, tk), lambda i, k: (i, k)),
                      rhs_spec,
                      pl.BlockSpec((Hp, Cp), lambda i, k: (0, 0))],
            out_specs=(pl.BlockSpec((tm, Hp), lambda i, k: (i, 0)),
                       pl.BlockSpec((tm, Cp), lambda i, k: (i, 0)),
                       pl.BlockSpec((tm, Cp), lambda i, k: (i, 0)))),
        compiler_params=params_2d,
    )(mat_p, hid, w2_p)

    hid_x = hid[:N, :H].astype(jnp.float32)
    bef_linear2 = bef[:N, :H]
    fin_x = fin[:N, :C]
    log_probs = out[:N, :C]
    return (hid_x, bef_linear2, fin_x), log_probs


def xavier_uniform(key, shape, dtype=jnp.float32):
    fan_in, fan_out = shape
    limit = math.sqrt(6.0 / (fan_in + fan_out))
    return jax.random.uniform(key, shape, dtype, minval=-limit, maxval=limit)


def build_normalized_adj(edge_index, num_nodes):
    """adj = convert_edge2adj(edge_index) + I, then row-normalize."""
    src, dst = edge_index
    adj = jnp.zeros((num_nodes, num_nodes), jnp.float32)
    adj = adj.at[src, dst].set(1.0)
    adj = adj.at[dst, src].set(1.0)            # undirected
    adj = adj + jnp.eye(num_nodes, dtype=jnp.float32)
    row_sum = jnp.sum(adj, axis=1, keepdims=True)
    return adj / jnp.maximum(row_sum, 1e-12)


if __name__ == "__main__":
    # Small deterministic problem: N=256 nodes, F=64 features, hid=32, C=16.
    N, F, H, C = 256, 64, 32, 16
    key = jax.random.PRNGKey(0)
    k_x, k_w1, k_w2 = jax.random.split(key, 3)

    # Deterministic ring graph edge_index [2, N]
    src = jnp.arange(N, dtype=jnp.int32)
    dst = (src + 1) % N
    edge_index = jnp.stack([src, dst], axis=0)

    mat = build_normalized_adj(edge_index, N)
    x = jax.random.normal(k_x, (N, F), jnp.float32)
    w1 = xavier_uniform(k_w1, (F, H))
    w2 = xavier_uniform(k_w2, (H, C))

    # Pure-JAX f32 reference (matches the PyTorch forward in eval mode).
    hid_ref = mat @ (x @ w1)
    bef_ref = mat @ hid_ref
    fin_ref = bef_ref @ w2
    out_ref = jax.nn.log_softmax(fin_ref, axis=1)

    # (a) f32 compute path: tight check of the tiled kernel structure (no
    #     host-side pad copies are made on this path since N is lane-aligned).
    (hid_f, bef_f, fin_f), out_f = sgc_forward(
        mat, x, w1, w2, compute_dtype=jnp.float32)
    jax.block_until_ready(out_f)
    for got, ref in ((hid_f, hid_ref), (bef_f, bef_ref),
                     (fin_f, fin_ref), (out_f, out_ref)):
        assert jnp.allclose(got, ref, atol=1e-3, rtol=1e-3)

    # (b) default bf16 streaming path (halved HBM traffic for the N*N mat);
    # looser tolerance because mat / x / x@w1 / hid are rounded to bfloat16
    # before the MXU (accumulation is still f32).  Note: the row-normalized
    # adjacency is no longer exactly row-stochastic in bf16.
    (hid_b, bef_b, fin_b), out_b = sgc_forward(mat, x, w1, w2)
    jax.block_until_ready(out_b)
    for got, ref in ((hid_b, hid_ref), (bef_b, bef_ref),
                     (fin_b, fin_ref), (out_b, out_ref)):
        assert jnp.allclose(got, ref, atol=5e-2, rtol=5e-2)

    print("KERNEL_OK")
</pallas_src>

<mosaic_0001>
module attributes {stable_mosaic.version = 11 : i64} {
  func.func @_prop_kernel(%arg0: i32, %arg1: i32, %arg2: memref<256x256xf32, #tpu.memory_space<vmem>>, %arg3: memref<256x128xf32, #tpu.memory_space<vmem>>, %arg4: memref<256x128xf32, #tpu.memory_space<vmem>>, %arg5: memref<256x128xf32, #tpu.memory_space<vmem>>) attributes {dimension_semantics = [#tpu.dimension_semantics<parallel>, #tpu.dimension_semantics<arbitrary>], iteration_bounds = array<i64: 1, 1>, scalar_prefetch = 0 : i64, scratch_operands = 1 : i64, tpu.core_type = #tpu.core_type<tc>, window_params = [{transform_indices = @transform_0, window_bounds = array<i64: 256, 256>}, {pipeline_mode = #tpu.pipeline_mode<synchronous>, transform_indices = @transform_1, window_bounds = array<i64: 256, 128>}, {transform_indices = @transform_2, window_bounds = array<i64: 256, 128>}]} {
    %c0_i32 = arith.constant 0 : i32
    %0 = arith.cmpi eq, %arg1, %c0_i32 : i32
    %1 = arith.extui %0 : i1 to i32
    %c0_i32_0 = arith.constant 0 : i32
    %2 = arith.cmpi ne, %1, %c0_i32_0 : i32
    scf.if %2 {
      %cst_9 = arith.constant 0.000000e+00 : f32
      %15 = vector.broadcast %cst_9 : f32 to vector<256x128xf32>
      %c0_10 = arith.constant 0 : index
      %c0_11 = arith.constant 0 : index
      %16 = vector.load %arg5[%c0_10, %c0_11] : memref<256x128xf32, #tpu.memory_space<vmem>>, vector<256x128xf32>
      tpu.vector_store %arg5[%c0_10, %c0_11], %15 {strides = array<i32>} : memref<256x128xf32, #tpu.memory_space<vmem>>, vector<256x128xf32>,
    } else {
    }
    %c256_i32 = arith.constant 256 : i32
    %3 = arith.muli %arg1, %c256_i32 : i32
    %4 = tpu.assume_multiple %3, 256 : i32
    %5 = arith.index_cast %4 : i32 to index
    %c0 = arith.constant 0 : index
    %6 = vector.load %arg3[%5, %c0] : memref<256x128xf32, #tpu.memory_space<vmem>>, vector<256x128xf32>
    %c0_1 = arith.constant 0 : index
    %c0_2 = arith.constant 0 : index
    %7 = vector.load %arg5[%c0_1, %c0_2] : memref<256x128xf32, #tpu.memory_space<vmem>>, vector<256x128xf32>
    %c0_3 = arith.constant 0 : index
    %c0_4 = arith.constant 0 : index
    %8 = vector.load %arg2[%c0_3, %c0_4] : memref<256x256xf32, #tpu.memory_space<vmem>>, vector<256x256xf32>
    %cst = arith.constant dense<0.000000e+00> : vector<256x128xf32>
    %9 = tpu.matmul %8, %6, %cst {dimension_numbers = #tpu.dot_dimension_numbers<[1], [0], [0], [1], [0, 0, 1, 1], [], []>} : vector<256x256xf32>, vector<256x128xf32>, vector<256x128xf32> -> vector<256x128xf32>
    %10 = arith.addf %7, %9 : vector<256x128xf32>
    %c0_5 = arith.constant 0 : index
    %c0_6 = arith.constant 0 : index
    %11 = vector.load %arg5[%c0_5, %c0_6] : memref<256x128xf32, #tpu.memory_space<vmem>>, vector<256x128xf32>
    tpu.vector_store %arg5[%c0_5, %c0_6], %10 {strides = array<i32>} : memref<256x128xf32, #tpu.memory_space<vmem>>, vector<256x128xf32>,
    %c0_i32_7 = arith.constant 0 : i32
    %12 = arith.cmpi eq, %arg1, %c0_i32_7 : i32
    %13 = arith.extui %12 : i1 to i32
    %c0_i32_8 = arith.constant 0 : i32
    %14 = arith.cmpi ne, %13, %c0_i32_8 : i32
    scf.if %14 {
      %c0_9 = arith.constant 0 : index
      %c0_10 = arith.constant 0 : index
      %15 = vector.load %arg5[%c0_9, %c0_10] : memref<256x128xf32, #tpu.memory_space<vmem>>, vector<256x128xf32>
      %c0_11 = arith.constant 0 : index
      %c0_12 = arith.constant 0 : index
      %16 = vector.load %arg4[%c0_11, %c0_12] : memref<256x128xf32, #tpu.memory_space<vmem>>, vector<256x128xf32>
      tpu.vector_store %arg4[%c0_11, %c0_12], %15 {strides = array<i32>} : memref<256x128xf32, #tpu.memory_space<vmem>>, vector<256x128xf32>,
    } else {
    }
    return
  }
  func.func @transform_0(%arg0: i32, %arg1: i32) -> (i32, i32) {
    %c0_i32 = arith.constant 0 : i32
    return %arg0, %arg1 : i32, i32
  }
  func.func @transform_1(%arg0: i32, %arg1: i32) -> (i32, i32) {
    %c0_i32 = arith.constant 0 : i32
    %c0_i32_0 = arith.constant 0 : i32
    %c0_i32_1 = arith.constant 0 : i32
    return %c0_i32, %c0_i32_0 : i32, i32
  }
  func.func @transform_2(%arg0: i32, %arg1: i32) -> (i32, i32) {
    %c0_i32 = arith.constant 0 : i32
    %c0_i32_0 = arith.constant 0 : i32
    return %arg0, %c0_i32 : i32, i32
  }
}

module attributes {stable_mosaic.version = 11 : i64} {
  func.func @_xw1_kernel(%arg0: i32, %arg1: memref<256x64xf32, #tpu.memory_space<vmem>>, %arg2: memref<64x128xf32, #tpu.memory_space<vmem>>, %arg3: memref<256x128xf32, #tpu.memory_space<vmem>>) attributes {dimension_semantics = [#tpu.dimension_semantics<parallel>], iteration_bounds = array<i64: 1>, scalar_prefetch = 0 : i64, scratch_operands = 0 : i64, tpu.core_type = #tpu.core_type<tc>, window_params = [{transform_indices = @transform_0, window_bounds = array<i64: 256, 64>}, {pipeline_mode = #tpu.pipeline_mode<synchronous>, transform_indices = @transform_1, window_bounds = array<i64: 64, 128>}, {transform_indices = @transform_2, window_bounds = array<i64: 256, 128>}]} {
    %c0 = arith.constant 0 : index
    %c0_0 = arith.constant 0 : index
    %0 = vector.load %arg1[%c0, %c0_0] : memref<256x64xf32, #tpu.memory_space<vmem>>, vector<256x64xf32>
    %c0_1 = arith.constant 0 : index
    %c0_2 = arith.constant 0 : index
    %1 = vector.load %arg2[%c0_1, %c0_2] : memref<64x128xf32, #tpu.memory_space<vmem>>, vector<64x128xf32>
    %cst = arith.constant dense<0.000000e+00> : vector<256x128xf32>
    %2 = tpu.matmul %0, %1, %cst {dimension_numbers = #tpu.dot_dimension_numbers<[1], [0], [0], [1], [0, 0, 1, 1], [], []>} : vector<256x64xf32>, vector<64x128xf32>, vector<256x128xf32> -> vector<256x128xf32>
    %c0_3 = arith.constant 0 : index
    %c0_4 = arith.constant 0 : index
    %3 = vector.load %arg3[%c0_3, %c0_4] : memref<256x128xf32, #tpu.memory_space<vmem>>, vector<256x128xf32>
    tpu.vector_store %arg3[%c0_3, %c0_4], %2 {strides = array<i32>} : memref<256x128xf32, #tpu.memory_space<vmem>>, vector<256x128xf32>,
    return
  }
  func.func @transform_0(%arg0: i32) -> (i32, i32) {
    %c0_i32 = arith.constant 0 : i32
    %c0_i32_0 = arith.constant 0 : i32
    return %arg0, %c0_i32 : i32, i32
  }
  func.func @transform_1(%arg0: i32) -> (i32, i32) {
    %c0_i32 = arith.constant 0 : i32
    %c0_i32_0 = arith.constant 0 : i32
    %c0_i32_1 = arith.constant 0 : i32
    return %c0_i32, %c0_i32_0 : i32, i32
  }
  func.func @transform_2(%arg0: i32) -> (i32, i32) {
    %c0_i32 = arith.constant 0 : i32
    %c0_i32_0 = arith.constant 0 : i32
    return %arg0, %c0_i32 : i32, i32
  }
}

module attributes {stable_mosaic.version = 11 : i64} {
  func.func @_prop_classify_kernel(%arg0: i32, %arg1: i32, %arg2: memref<256x256xf32, #tpu.memory_space<vmem>>, %arg3: memref<256x128xf32, #tpu.memory_space<vmem>>, %arg4: memref<128x128xf32, #tpu.memory_space<vmem>>, %arg5: memref<256x128xf32, #tpu.memory_space<vmem>>, %arg6: memref<256x128xf32, #tpu.memory_space<vmem>>, %arg7: memref<256x128xf32, #tpu.memory_space<vmem>>) attributes {dimension_semantics = [#tpu.dimension_semantics<parallel>, #tpu.dimension_semantics<arbitrary>], iteration_bounds = array<i64: 1, 1>, scalar_prefetch = 0 : i64, scratch_operands = 0 : i64, tpu.core_type = #tpu.core_type<tc>, window_params = [{transform_indices = @transform_0, window_bounds = array<i64: 256, 256>}, {pipeline_mode = #tpu.pipeline_mode<synchronous>, transform_indices = @transform_1, window_bounds = array<i64: 256, 128>}, {pipeline_mode = #tpu.pipeline_mode<synchronous>, transform_indices = @transform_2, window_bounds = array<i64: 128, 128>}, {transform_indices = @transform_3, window_bounds = array<i64: 256, 128>}, {transform_indices = @transform_4, window_bounds = array<i64: 256, 128>}, {transform_indices = @transform_5, window_bounds = array<i64: 256, 128>}]} {
    %c0_i32 = arith.constant 0 : i32
    %0 = arith.cmpi eq, %arg1, %c0_i32 : i32
    %1 = arith.extui %0 : i1 to i32
    %c0_i32_0 = arith.constant 0 : i32
    %2 = arith.cmpi ne, %1, %c0_i32_0 : i32
    scf.if %2 {
      %cst_9 = arith.constant 0.000000e+00 : f32
      %15 = vector.broadcast %cst_9 : f32 to vector<256x128xf32>
      %c0_10 = arith.constant 0 : index
      %c0_11 = arith.constant 0 : index
      %16 = vector.load %arg5[%c0_10, %c0_11] : memref<256x128xf32, #tpu.memory_space<vmem>>, vector<256x128xf32>
      tpu.vector_store %arg5[%c0_10, %c0_11], %15 {strides = array<i32>} : memref<256x128xf32, #tpu.memory_space<vmem>>, vector<256x128xf32>,
    } else {
    }
    %c256_i32 = arith.constant 256 : i32
    %3 = arith.muli %arg1, %c256_i32 : i32
    %4 = tpu.assume_multiple %3, 256 : i32
    %5 = arith.index_cast %4 : i32 to index
    %c0 = arith.constant 0 : index
    %6 = vector.load %arg3[%5, %c0] : memref<256x128xf32, #tpu.memory_space<vmem>>, vector<256x128xf32>
    %c0_1 = arith.constant 0 : index
    %c0_2 = arith.constant 0 : index
    %7 = vector.load %arg5[%c0_1, %c0_2] : memref<256x128xf32, #tpu.memory_space<vmem>>, vector<256x128xf32>
    %c0_3 = arith.constant 0 : index
    %c0_4 = arith.constant 0 : index
    %8 = vector.load %arg2[%c0_3, %c0_4] : memref<256x256xf32, #tpu.memory_space<vmem>>, vector<256x256xf32>
    %cst = arith.constant dense<0.000000e+00> : vector<256x128xf32>
    %9 = tpu.matmul %8, %6, %cst {dimension_numbers = #tpu.dot_dimension_numbers<[1], [0], [0], [1], [0, 0, 1, 1], [], []>} : vector<256x256xf32>, vector<256x128xf32>, vector<256x128xf32> -> vector<256x128xf32>
    %10 = arith.addf %7, %9 : vector<256x128xf32>
    %c0_5 = arith.constant 0 : index
    %c0_6 = arith.constant 0 : index
    %11 = vector.load %arg5[%c0_5, %c0_6] : memref<256x128xf32, #tpu.memory_space<vmem>>, vector<256x128xf32>
    tpu.vector_store %arg5[%c0_5, %c0_6], %10 {strides = array<i32>} : memref<256x128xf32, #tpu.memory_space<vmem>>, vector<256x128xf32>,
    %c0_i32_7 = arith.constant 0 : i32
    %12 = arith.cmpi eq, %arg1, %c0_i32_7 : i32
    %13 = arith.extui %12 : i1 to i32
    %c0_i32_8 = arith.constant 0 : i32
    %14 = arith.cmpi ne, %13, %c0_i32_8 : i32
    scf.if %14 {
      %c0_9 = arith.constant 0 : index
      %c0_10 = arith.constant 0 : index
      %15 = vector.load %arg5[%c0_9, %c0_10] : memref<256x128xf32, #tpu.memory_space<vmem>>, vector<256x128xf32>
      %c0_11 = arith.constant 0 : index
      %c0_12 = arith.constant 0 : index
      %16 = vector.load %arg4[%c0_11, %c0_12] : memref<128x128xf32, #tpu.memory_space<vmem>>, vector<128x128xf32>
      %cst_13 = arith.constant dense<0.000000e+00> : vector<256x128xf32>
      %17 = tpu.matmul %15, %16, %cst_13 {dimension_numbers = #tpu.dot_dimension_numbers<[1], [0], [0], [1], [0, 0, 1, 1], [], []>} : vector<256x128xf32>, vector<128x128xf32>, vector<256x128xf32> -> vector<256x128xf32>
      %c0_14 = arith.constant 0 : index
      %c0_15 = arith.constant 0 : index
      %18 = vector.load %arg6[%c0_14, %c0_15] : memref<256x128xf32, #tpu.memory_space<vmem>>, vector<256x128xf32>
      tpu.vector_store %arg6[%c0_14, %c0_15], %17 {strides = array<i32>} : memref<256x128xf32, #tpu.memory_space<vmem>>, vector<256x128xf32>,
      %19 = tpu.iota {dimensions = array<i32: 1>} : vector<256x128xi32>
      %c16_i32 = arith.constant 16 : i32
      %20 = vector.broadcast %c16_i32 : i32 to vector<256x128xi32>
      %21 = arith.cmpi slt, %19, %20 : vector<256x128xi32>
      %cst_16 = arith.constant 0xFF800000 : f32
      %22 = vector.broadcast %cst_16 : f32 to vector<256x128xf32>
      %23 = arith.select %21, %17, %22 : vector<256x128xi1>, vector<256x128xf32>
      %cst_17 = arith.constant dense<0xFF800000> : vector<256xf32>
      %24 = vector.multi_reduction <maximumf>, %23, %cst_17 [1] : vector<256x128xf32> to vector<256xf32>
      %25 = vector.shape_cast %24 : vector<256xf32> to vector<256x1xf32>
      %26 = vector.broadcast %25 : vector<256x1xf32> to vector<256x128xf32>
      %27 = arith.subf %23, %26 : vector<256x128xf32>
      %28 = math.exp %27 : vector<256x128xf32>
      %cst_18 = arith.constant 0.000000e+00 : f32
      %29 = vector.broadcast %cst_18 : f32 to vector<256x128xf32>
      %30 = arith.select %21, %28, %29 : vector<256x128xi1>, vector<256x128xf32>
      %cst_19 = arith.constant dense<0.000000e+00> : vector<256xf32>
      %31 = vector.multi_reduction <add>, %30, %cst_19 [1] : vector<256x128xf32> to vector<256xf32>
      %32 = vector.shape_cast %31 : vector<256xf32> to vector<256x1xf32>
      %33 = math.log %32 : vector<256x1xf32>
      %34 = vector.broadcast %25 : vector<256x1xf32> to vector<256x128xf32>
      %35 = arith.subf %17, %34 : vector<256x128xf32>
      %36 = vector.broadcast %33 : vector<256x1xf32> to vector<256x128xf32>
      %37 = arith.subf %35, %36 : vector<256x128xf32>
      %c0_20 = arith.constant 0 : index
      %c0_21 = arith.constant 0 : index
      %38 = vector.load %arg7[%c0_20, %c0_21] : memref<256x128xf32, #tpu.memory_space<vmem>>, vector<256x128xf32>
      tpu.vector_store %arg7[%c0_20, %c0_21], %37 {strides = array<i32>} : memref<256x128xf32, #tpu.memory_space<vmem>>, vector<256x128xf32>,
    } else {
    }
    return
  }
  func.func @transform_0(%arg0: i32, %arg1: i32) -> (i32, i32) {
    %c0_i32 = arith.constant 0 : i32
    return %arg0, %arg1 : i32, i32
  }
  func.func @transform_1(%arg0: i32, %arg1: i32) -> (i32, i32) {
    %c0_i32 = arith.constant 0 : i32
    %c0_i32_0 = arith.constant 0 : i32
    %c0_i32_1 = arith.constant 0 : i32
    return %c0_i32, %c0_i32_0 : i32, i32
  }
  func.func @transform_2(%arg0: i32, %arg1: i32) -> (i32, i32) {
    %c0_i32 = arith.constant 0 : i32
    %c0_i32_0 = arith.constant 0 : i32
    %c0_i32_1 = arith.constant 0 : i32
    return %c0_i32, %c0_i32_0 : i32, i32
  }
  func.func @transform_3(%arg0: i32, %arg1: i32) -> (i32, i32) {
    %c0_i32 = arith.constant 0 : i32
    %c0_i32_0 = arith.constant 0 : i32
    return %arg0, %c0_i32 : i32, i32
  }
  func.func @transform_4(%arg0: i32, %arg1: i32) -> (i32, i32) {
    %c0_i32 = arith.constant 0 : i32
    %c0_i32_0 = arith.constant 0 : i32
    return %arg0, %c0_i32 : i32, i32
  }
  func.func @transform_5(%arg0: i32, %arg1: i32) -> (i32, i32) {
    %c0_i32 = arith.constant 0 : i32
    %c0_i32_0 = arith.constant 0 : i32
    return %arg0, %c0_i32 : i32, i32
  }
}

</mosaic_0001>

<bundles_post_ra>
// kernel: sgc_forward.3
= control target key start
LH: loop header
LB: loop body
LE: loop exit
PB: predicated region body
PF: predicated region fallthrough
CT: control target
= control target key end

     0   :  { %vm51_vm0 = vcmask 523264   ;;  %s832_s1 = inlined_call_operand.vmem [shape: f32[64,128], index: 1, kind: input, shape index: {}]   ;;  %s833_s0 = inlined_call_operand.vmem [shape: f32[256,64], index: 0, kind: input, shape index: {}]   ;;  %s834_s2 = inlined_call_operand.vmem [shape: f32[256,128], index: 2, kind: output, shape index: {}]  }
   0x1   :  { %v43_v0 = vld [vmem:[%s832_s1] sm:$0xff]  ;;  %v44_v1 = vld [vmem:[%s832_s1 + $0x8] sm:$0xff]  ;;  %v45_v2 = vld [vmem:[%s832_s1 + $0x10] sm:$0xff] }
   0x2   :  { %v545_v3 = vpack.c.bf16 %v44_v1, %v43_v0  ;;  %v46_v4 = vld [vmem:[%s832_s1 + $0x18] sm:$0xff]  ;;  %v47_v6 = vld [vmem:[%s832_s1 + $0x20] sm:$0xff]  ;;  %v48_v7 = vld [vmem:[%s832_s1 + $0x28] sm:$0xff] }
   0x3   :  { %v549_v5 = vpack.c.bf16 %v46_v4, %v45_v2  ;;  %v11_v8 = vld [vmem:[%s833_s0] sm:$0xff]  ;;  %v553_v10 = vpack.c.bf16 %v48_v7, %v47_v6  ;;  %v49_v11 = vld [vmem:[%s832_s1 + $0x30] sm:$0xff]  ;;  %v50_v12 = vld [vmem:[%s832_s1 + $0x38] sm:$0xff] }
   0x4   :  { %546 = vmatprep.subr.bf16.mxu0 %v545_v3  ;;  %561 = vmatprep.subr.bf16.mxu1 %v545_v3  ;;  %v27_v9 = vld [vmem:[%s833_s0 + $0x80] sm:$0xff]  ;;  %v557_v13 = vpack.c.bf16 %v50_v12, %v49_v11  ;;  %v12_v14 = vld [vmem:[%s833_s0 + $0x8] sm:$0xff]  ;;  %v13_v16 = vld [vmem:[%s833_s0 + $0x10] sm:$0xff] }
   0x5   :  { %548 = vmatpush3.bf16.msra.mxu0 %v545_v3  ;;  %565 = vmatpush3.bf16.msra.mxu1 %v545_v3  ;;  %v28_v15 = vld [vmem:[%s833_s0 + $0x88] sm:$0xff]  ;;  %v29_v17 = vld [vmem:[%s833_s0 + $0x90] sm:$0xff]  ;;  %v14_v18 = vld [vmem:[%s833_s0 + $0x18] sm:$0xff] }
   0x6   :  { %550 = vmatprep.subr.bf16.mxu0 %v549_v5  ;;  %562 = vmatprep.subr.bf16.mxu1 %v549_v5  ;;  %v30_v19 = vld [vmem:[%s833_s0 + $0x98] sm:$0xff]  ;;  %v15_v20 = vld [vmem:[%s833_s0 + $0x20] sm:$0xff]  ;;  %v16_v22 = vld [vmem:[%s833_s0 + $0x28] sm:$0xff] }
   0x7   :  { %497 = vmatprep.mubr.msk.f32.mxu0 %vm51_vm0, %v11_v8  ;;  %521 = vmatprep.mubr.msk.f32.mxu1 %vm51_vm0, %v27_v9  ;;  %v31_v21 = vld [vmem:[%s833_s0 + $0xa0] sm:$0xff]  ;;  %v32_v23 = vld [vmem:[%s833_s0 + $0xa8] sm:$0xff]  ;;  %v17_v24 = vld [vmem:[%s833_s0 + $0x30] sm:$0xff] }
   0x8   :  { %v33_v25 = vld [vmem:[%s833_s0 + $0xb0] sm:$0xff]  ;;  %v18_v26 = vld [vmem:[%s833_s0 + $0x38] sm:$0xff]  ;;  %v19_v28 = vld [vmem:[%s833_s0 + $0x40] sm:$0xff] }
   0x9   :  { %552 = vmatpush3.bf16.msra.mxu0 %v549_v5  ;;  %566 = vmatpush3.bf16.msra.mxu1 %v549_v5  ;;  %v34_v27 = vld [vmem:[%s833_s0 + $0xb8] sm:$0xff]  ;;  %v35_v29 = vld [vmem:[%s833_s0 + $0xc0] sm:$0xff]  ;;  %v20_v30 = vld [vmem:[%s833_s0 + $0x48] sm:$0xff] }
   0xa   :  { %554 = vmatprep.subr.bf16.mxu0 %v553_v10  ;;  %563 = vmatprep.subr.bf16.mxu1 %v553_v10  ;;  %v36_v31 = vld [vmem:[%s833_s0 + $0xc8] sm:$0xff]  ;;  %v21_v32 = vld [vmem:[%s833_s0 + $0x50] sm:$0xff]  ;;  %v22_v34 = vld [vmem:[%s833_s0 + $0x58] sm:$0xff] }
   0xb   :  { %v37_v33 = vld [vmem:[%s833_s0 + $0xd0] sm:$0xff]  ;;  %v38_v35 = vld [vmem:[%s833_s0 + $0xd8] sm:$0xff]  ;;  %v23_v36 = vld [vmem:[%s833_s0 + $0x60] sm:$0xff] }
   0xc   :  { %v39_v37 = vld [vmem:[%s833_s0 + $0xe0] sm:$0xff]  ;;  %v24_v38 = vld [vmem:[%s833_s0 + $0x68] sm:$0xff]  ;;  %v25_v40 = vld [vmem:[%s833_s0 + $0x70] sm:$0xff] }
   0xd   :  { %556 = vmatpush3.bf16.msra.mxu0 %v553_v10  ;;  %567 = vmatpush3.bf16.msra.mxu1 %v553_v10  ;;  %v40_v39 = vld [vmem:[%s833_s0 + $0xe8] sm:$0xff]  ;;  %v41_v41 = vld [vmem:[%s833_s0 + $0xf0] sm:$0xff]  ;;  %v26_v42 = vld [vmem:[%s833_s0 + $0x78] sm:$0xff] }
   0xe   :  { %558 = vmatprep.subr.bf16.mxu0 %v557_v13  ;;  %564 = vmatprep.subr.bf16.mxu1 %v557_v13  ;;  %v42_v43 = vld [vmem:[%s833_s0 + $0xf8] sm:$0xff] }
  0x11   :  { %560 = vmatpush3.bf16.msra.mxu0 %v557_v13  ;;  %568 = vmatpush3.bf16.msra.mxu1 %v557_v13 }
  0x14   :  { %498 = vmatmul.mubr.msk.f32.vlgmr.msra.gmra.mrb[0].mxu0 %vm51_vm0, %v12_v14  ;;  %522 = vmatmul.mubr.msk.f32.vlgmr.msra.gmra.mrb[0].mxu1 %vm51_vm0, %v28_v15 }
  0x15   :  { %500 = vmatprep.mubr.msk.f32.mxu0 %vm51_vm0, %v13_v16  ;;  %524 = vmatprep.mubr.msk.f32.mxu1 %vm51_vm0, %v29_v17 }
  0x18   :  { %501 = vmatmul.mubr.msk.f32.gmra.mrb[2].mxu0 %vm51_vm0, %v14_v18  ;;  %525 = vmatmul.mubr.msk.f32.gmra.mrb[2].mxu1 %vm51_vm0, %v30_v19 }
  0x19   :  { %503 = vmatprep.mubr.msk.f32.mxu0 %vm51_vm0, %v15_v20  ;;  %527 = vmatprep.mubr.msk.f32.mxu1 %vm51_vm0, %v31_v21 }
  0x1c   :  { %504 = vmatmul.mubr.msk.f32.gmra.mrb[4].mxu0 %vm51_vm0, %v16_v22  ;;  %528 = vmatmul.mubr.msk.f32.gmra.mrb[4].mxu1 %vm51_vm0, %v32_v23 }
  0x1d   :  { %506 = vmatprep.mubr.msk.f32.mxu0 %vm51_vm0, %v17_v24  ;;  %530 = vmatprep.mubr.msk.f32.mxu1 %vm51_vm0, %v33_v25 }
  0x20   :  { %507 = vmatmul.mubr.msk.f32.gmra.mrb[6].mxu0 %vm51_vm0, %v18_v26  ;;  %531 = vmatmul.mubr.msk.f32.gmra.mrb[6].mxu1 %vm51_vm0, %v34_v27 }
  0x21   :  { %509 = vmatprep.mubr.msk.f32.mxu0 %vm51_vm0, %v19_v28  ;;  %533 = vmatprep.mubr.msk.f32.mxu1 %vm51_vm0, %v35_v29 }
  0x24   :  { %510 = vmatmul.mubr.msk.f32.gmra.mrb[8].mxu0 %vm51_vm0, %v20_v30  ;;  %534 = vmatmul.mubr.msk.f32.gmra.mrb[8].mxu1 %vm51_vm0, %v36_v31 }
  0x25   :  { %512 = vmatprep.mubr.msk.f32.mxu0 %vm51_vm0, %v21_v32  ;;  %536 = vmatprep.mubr.msk.f32.mxu1 %vm51_vm0, %v37_v33 }
  0x28   :  { %513 = vmatmul.mubr.msk.f32.gmra.mrb[10].mxu0 %vm51_vm0, %v22_v34  ;;  %537 = vmatmul.mubr.msk.f32.gmra.mrb[10].mxu1 %vm51_vm0, %v38_v35 }
  0x29   :  { %515 = vmatprep.mubr.msk.f32.mxu0 %vm51_vm0, %v23_v36  ;;  %539 = vmatprep.mubr.msk.f32.mxu1 %vm51_vm0, %v39_v37 }
  0x2c   :  { %516 = vmatmul.mubr.msk.f32.gmra.mrb[12].mxu0 %vm51_vm0, %v24_v38  ;;  %540 = vmatmul.mubr.msk.f32.gmra.mrb[12].mxu1 %vm51_vm0, %v40_v39 }
  0x2d   :  { %518 = vmatprep.mubr.msk.f32.mxu0 %vm51_vm0, %v25_v40  ;;  %542 = vmatprep.mubr.msk.f32.mxu1 %vm51_vm0, %v41_v41 }
  0x30   :  { %519 = vmatmul.mubr.msk.f32.gmra.mrb[14].mxu0 %vm51_vm0, %v26_v42  ;;  %543 = vmatmul.mubr.msk.f32.gmra.mrb[14].mxu1 %vm51_vm0, %v42_v43 }
  0xe7   :  { %v499_v44 = vpop.f32.mrb[0].mxu0  ;;  %v523_v45 = vpop.f32.mrb[0].mxu1 }
  0xe8   :  { %374 = vst [vmem:[%s834_s2 + $0x8] sm:$0xff] %v499_v44  ;;  %390 = vst [vmem:[%s834_s2 + $0x88] sm:$0xff] %v523_v45  ;;  %v214_v46 = vpop.f32.mrb[1].mxu0  ;;  %v294_v47 = vpop.f32.mrb[1].mxu1 }
  0xe9   :  { %373 = vst [vmem:[%s834_s2] sm:$0xff] %v214_v46  ;;  %389 = vst [vmem:[%s834_s2 + $0x80] sm:$0xff] %v294_v47 }
  0xeb   :  { %v502_v48 = vpop.f32.mrb[2].mxu0  ;;  %v526_v49 = vpop.f32.mrb[2].mxu1 }
  0xec   :  { %376 = vst [vmem:[%s834_s2 + $0x18] sm:$0xff] %v502_v48  ;;  %392 = vst [vmem:[%s834_s2 + $0x98] sm:$0xff] %v526_v49  ;;  %v224_v50 = vpop.f32.mrb[3].mxu0  ;;  %v304_v51 = vpop.f32.mrb[3].mxu1 }
  0xed   :  { %375 = vst [vmem:[%s834_s2 + $0x10] sm:$0xff] %v224_v50  ;;  %391 = vst [vmem:[%s834_s2 + $0x90] sm:$0xff] %v304_v51 }
  0xef   :  { %v505_v52 = vpop.f32.mrb[4].mxu0  ;;  %v529_v53 = vpop.f32.mrb[4].mxu1 }
  0xf0   :  { %378 = vst [vmem:[%s834_s2 + $0x28] sm:$0xff] %v505_v52  ;;  %394 = vst [vmem:[%s834_s2 + $0xa8] sm:$0xff] %v529_v53  ;;  %v234_v54 = vpop.f32.mrb[5].mxu0  ;;  %v314_v55 = vpop.f32.mrb[5].mxu1 }
  0xf1   :  { %377 = vst [vmem:[%s834_s2 + $0x20] sm:$0xff] %v234_v54  ;;  %393 = vst [vmem:[%s834_s2 + $0xa0] sm:$0xff] %v314_v55 }
  0xf3   :  { %v508_v56 = vpop.f32.mrb[6].mxu0  ;;  %v532_v57 = vpop.f32.mrb[6].mxu1 }
  0xf4   :  { %380 = vst [vmem:[%s834_s2 + $0x38] sm:$0xff] %v508_v56  ;;  %396 = vst [vmem:[%s834_s2 + $0xb8] sm:$0xff] %v532_v57  ;;  %v244_v58 = vpop.f32.mrb[7].mxu0  ;;  %v324_v59 = vpop.f32.mrb[7].mxu1 }
  0xf5   :  { %379 = vst [vmem:[%s834_s2 + $0x30] sm:$0xff] %v244_v58  ;;  %395 = vst [vmem:[%s834_s2 + $0xb0] sm:$0xff] %v324_v59 }
  0xf7   :  { %v511_v60 = vpop.f32.mrb[8].mxu0  ;;  %v535_v61 = vpop.f32.mrb[8].mxu1 }
  0xf8   :  { %382 = vst [vmem:[%s834_s2 + $0x48] sm:$0xff] %v511_v60  ;;  %398 = vst [vmem:[%s834_s2 + $0xc8] sm:$0xff] %v535_v61  ;;  %v254_v62 = vpop.f32.mrb[9].mxu0  ;;  %v334_v63 = vpop.f32.mrb[9].mxu1 }
  0xf9   :  { %381 = vst [vmem:[%s834_s2 + $0x40] sm:$0xff] %v254_v62  ;;  %397 = vst [vmem:[%s834_s2 + $0xc0] sm:$0xff] %v334_v63 }
  0xfb   :  { %v514_v0 = vpop.f32.mrb[10].mxu0  ;;  %v538_v1 = vpop.f32.mrb[10].mxu1 }
  0xfc   :  { %384 = vst [vmem:[%s834_s2 + $0x58] sm:$0xff] %v514_v0  ;;  %400 = vst [vmem:[%s834_s2 + $0xd8] sm:$0xff] %v538_v1  ;;  %v264_v2 = vpop.f32.mrb[11].mxu0  ;;  %v344_v3 = vpop.f32.mrb[11].mxu1 }
  0xfd   :  { %383 = vst [vmem:[%s834_s2 + $0x50] sm:$0xff] %v264_v2  ;;  %399 = vst [vmem:[%s834_s2 + $0xd0] sm:$0xff] %v344_v3 }
  0xff   :  { %v517_v4 = vpop.f32.mrb[12].mxu0  ;;  %v541_v5 = vpop.f32.mrb[12].mxu1 }
 0x100   :  { %386 = vst [vmem:[%s834_s2 + $0x68] sm:$0xff] %v517_v4  ;;  %402 = vst [vmem:[%s834_s2 + $0xe8] sm:$0xff] %v541_v5  ;;  %v274_v6 = vpop.f32.mrb[13].mxu0  ;;  %v354_v7 = vpop.f32.mrb[13].mxu1 }
 0x101   :  { %385 = vst [vmem:[%s834_s2 + $0x60] sm:$0xff] %v274_v6  ;;  %401 = vst [vmem:[%s834_s2 + $0xe0] sm:$0xff] %v354_v7 }
 0x103   :  { %v520_v8 = vpop.f32.mrb[14].mxu0  ;;  %v544_v9 = vpop.f32.mrb[14].mxu1 }
 0x104   :  { %388 = vst [vmem:[%s834_s2 + $0x78] sm:$0xff] %v520_v8  ;;  %404 = vst [vmem:[%s834_s2 + $0xf8] sm:$0xff] %v544_v9  ;;  %v284_v10 = vpop.f32.mrb[15].mxu0  ;;  %v364_v11 = vpop.f32.mrb[15].mxu1 }
 0x105   :  { %387 = vst [vmem:[%s834_s2 + $0x70] sm:$0xff] %v284_v10  ;;  %403 = vst [vmem:[%s834_s2 + $0xf0] sm:$0xff] %v364_v11 }

// kernel: sgc_forward.4
= control target key start
LH: loop header
LB: loop body
LE: loop exit
PB: predicated region body
PF: predicated region fallthrough
CT: control target
= control target key end

     0   :  { %v618_v0 = vmov 0.0|0.0   ;;  %s1050_s1 = inlined_call_operand.vmem [shape: f32[256,128], index: 1, kind: input, shape index: {}]   ;;  %s1051_s0 = inlined_call_operand.vmem [shape: f32[256,256], index: 0, kind: input, shape index: {}]   ;;  %s1052_s2 = inlined_call_operand.vmem [shape: f32[256,128], index: 2, kind: output, shape index: {}]  }
   0x1   :  { %537 = vmatprep.subr.bf16.mxu0 %v618_v0  ;;  %585 = vmatprep.subr.bf16.mxu1 %v618_v0  ;;  %v49_v1 = vld [vmem:[%s1050_s1] sm:$0xff]  ;;  %v50_v2 = vld [vmem:[%s1050_s1 + $0x8] sm:$0xff]  ;;  %v51_v3 = vld [vmem:[%s1050_s1 + $0x10] sm:$0xff] }
   0x2   :  { %v538_v4 = vpack.c.bf16 %v50_v2, %v49_v1  ;;  %v52_v5 = vld [vmem:[%s1050_s1 + $0x18] sm:$0xff]  ;;  %v53_v7 = vld [vmem:[%s1050_s1 + $0x20] sm:$0xff]  ;;  %v54_v8 = vld [vmem:[%s1050_s1 + $0x28] sm:$0xff] }
   0x3   :  { %v541_v6 = vpack.c.bf16 %v52_v5, %v51_v3  ;;  %v544_v9 = vpack.c.bf16 %v54_v8, %v53_v7  ;;  %v55_v10 = vld [vmem:[%s1050_s1 + $0x30] sm:$0xff]  ;;  %v56_v11 = vld [vmem:[%s1050_s1 + $0x38] sm:$0xff]  ;;  %v114_v12 = vld [vmem:[%s1051_s0 + $0x8] sm:$0xff] }
   0x4   :  { %539 = vmatpush1.bf16.msra.mxu0 %v538_v4  ;;  %601 = vmatpush1.bf16.msra.mxu1 %v538_v4  ;;  %v547_v13 = vpack.c.bf16 %v56_v11, %v55_v10  ;;  %v146_v14 = vld [vmem:[%s1051_s0 + $0x108] sm:$0xff]  ;;  %v57_v15 = vld [vmem:[%s1050_s1 + $0x40] sm:$0xff]  ;;  %v59_v18 = vld [vmem:[%s1050_s1 + $0x50] sm:$0xff] }
   0x5   :  { %540 = vmatprep.subr.bf16.mxu0 %v618_v0  ;;  %586 = vmatprep.subr.bf16.mxu1 %v618_v0  ;;  %v58_v16 = vld [vmem:[%s1050_s1 + $0x48] sm:$0xff]  ;;  %v60_v19 = vld [vmem:[%s1050_s1 + $0x58] sm:$0xff]  ;;  %v61_v21 = vld [vmem:[%s1050_s1 + $0x60] sm:$0xff] }
   0x6   :  { %241 = vmatprep.mubr.f32.mxu0 %v114_v12  ;;  %321 = vmatprep.mubr.f32.mxu1 %v146_v14  ;;  %v550_v17 = vpack.c.bf16 %v58_v16, %v57_v15  ;;  %v553_v20 = vpack.c.bf16 %v60_v19, %v59_v18  ;;  %v62_v22 = vld [vmem:[%s1050_s1 + $0x68] sm:$0xff]  ;;  %v63_v24 = vld [vmem:[%s1050_s1 + $0x70] sm:$0xff]  ;;  %v64_v25 = vld [vmem:[%s1050_s1 + $0x78] sm:$0xff] }
   0x7   :  { %v556_v23 = vpack.c.bf16 %v62_v22, %v61_v21  ;;  %v559_v26 = vpack.c.bf16 %v64_v25, %v63_v24  ;;  %v65_v27 = vld [vmem:[%s1050_s1 + $0x80] sm:$0xff]  ;;  %v66_v28 = vld [vmem:[%s1050_s1 + $0x88] sm:$0xff]  ;;  %v67_v30 = vld [vmem:[%s1050_s1 + $0x90] sm:$0xff] }
   0x8   :  { %542 = vmatpush1.bf16.msra.mxu0 %v541_v6  ;;  %602 = vmatpush1.bf16.msra.mxu1 %v541_v6  ;;  %v562_v29 = vpack.c.bf16 %v66_v28, %v65_v27  ;;  %v68_v31 = vld [vmem:[%s1050_s1 + $0x98] sm:$0xff]  ;;  %v69_v33 = vld [vmem:[%s1050_s1 + $0xa0] sm:$0xff]  ;;  %v70_v34 = vld [vmem:[%s1050_s1 + $0xa8] sm:$0xff] }
   0x9   :  { %543 = vmatprep.subr.bf16.mxu0 %v618_v0  ;;  %587 = vmatprep.subr.bf16.mxu1 %v618_v0  ;;  %v565_v32 = vpack.c.bf16 %v68_v31, %v67_v30  ;;  %v568_v35 = vpack.c.bf16 %v70_v34, %v69_v33  ;;  %v71_v36 = vld [vmem:[%s1050_s1 + $0xb0] sm:$0xff]  ;;  %v72_v37 = vld [vmem:[%s1050_s1 + $0xb8] sm:$0xff]  ;;  %v73_v39 = vld [vmem:[%s1050_s1 + $0xc0] sm:$0xff] }
   0xa   :  { %v571_v38 = vpack.c.bf16 %v72_v37, %v71_v36  ;;  %v74_v40 = vld [vmem:[%s1050_s1 + $0xc8] sm:$0xff]  ;;  %v75_v42 = vld [vmem:[%s1050_s1 + $0xd0] sm:$0xff]  ;;  %v76_v43 = vld [vmem:[%s1050_s1 + $0xd8] sm:$0xff] }
   0xb   :  { %v574_v41 = vpack.c.bf16 %v74_v40, %v73_v39  ;;  %v577_v44 = vpack.c.bf16 %v76_v43, %v75_v42  ;;  %v77_v45 = vld [vmem:[%s1050_s1 + $0xe0] sm:$0xff]  ;;  %v78_v46 = vld [vmem:[%s1050_s1 + $0xe8] sm:$0xff]  ;;  %v79_v48 = vld [vmem:[%s1050_s1 + $0xf0] sm:$0xff] }
   0xc   :  { %545 = vmatpush1.bf16.msra.mxu0 %v544_v9  ;;  %603 = vmatpush1.bf16.msra.mxu1 %v544_v9  ;;  %v580_v47 = vpack.c.bf16 %v78_v46, %v77_v45  ;;  %v80_v49 = vld [vmem:[%s1050_s1 + $0xf8] sm:$0xff]  ;;  %v113_v51 = vld [vmem:[%s1051_s0] sm:$0xff]  ;;  %v115_v55 = vld [vmem:[%s1051_s0 + $0x10] sm:$0xff] }
   0xd   :  { %546 = vmatprep.subr.bf16.mxu0 %v618_v0  ;;  %588 = vmatprep.subr.bf16.mxu1 %v618_v0  ;;  %v583_v50 = vpack.c.bf16 %v80_v49, %v79_v48  ;;  %v145_v52 = vld [vmem:[%s1051_s0 + $0x100] sm:$0xff]  ;;  %v116_v53 = vld [vmem:[%s1051_s0 + $0x18] sm:$0xff]  ;;  %v147_v56 = vld [vmem:[%s1051_s0 + $0x110] sm:$0xff] }
   0xe   :  { %v148_v54 = vld [vmem:[%s1051_s0 + $0x118] sm:$0xff]  ;;  %v118_v57 = vld [vmem:[%s1051_s0 + $0x28] sm:$0xff]  ;;  %v117_v59 = vld [vmem:[%s1051_s0 + $0x20] sm:$0xff] }
   0xf   :  { %v150_v58 = vld [vmem:[%s1051_s0 + $0x128] sm:$0xff]  ;;  %v149_v60 = vld [vmem:[%s1051_s0 + $0x120] sm:$0xff]  ;;  %v120_v61 = vld [vmem:[%s1051_s0 + $0x38] sm:$0xff] }
  0x10   :  { %548 = vmatpush1.bf16.msra.mxu0 %v547_v13  ;;  %604 = vmatpush1.bf16.msra.mxu1 %v547_v13  ;;  %v152_v62 = vld [vmem:[%s1051_s0 + $0x138] sm:$0xff]  ;;  %v119_v63 = vld [vmem:[%s1051_s0 + $0x30] sm:$0xff]  ;;  %v122_v1 = vld [vmem:[%s1051_s0 + $0x48] sm:$0xff] }
  0x11   :  { %549 = vmatprep.subr.bf16.mxu0 %v618_v0  ;;  %589 = vmatprep.subr.bf16.mxu1 %v618_v0  ;;  %v154_v2 = vld [vmem:[%s1051_s0 + $0x148] sm:$0xff]  ;;  %v121_v3 = vld [vmem:[%s1051_s0 + $0x40] sm:$0xff]  ;;  %v124_v5 = vld [vmem:[%s1051_s0 + $0x58] sm:$0xff] }
  0x12   :  { %v153_v4 = vld [vmem:[%s1051_s0 + $0x140] sm:$0xff]  ;;  %v156_v6 = vld [vmem:[%s1051_s0 + $0x158] sm:$0xff]  ;;  %v123_v7 = vld [vmem:[%s1051_s0 + $0x50] sm:$0xff] }
  0x13   :  { %v155_v8 = vld [vmem:[%s1051_s0 + $0x150] sm:$0xff]  ;;  %v126_v9 = vld [vmem:[%s1051_s0 + $0x68] sm:$0xff]  ;;  %v125_v11 = vld [vmem:[%s1051_s0 + $0x60] sm:$0xff] }
  0x14   :  { %551 = vmatpush1.bf16.msra.mxu0 %v550_v17  ;;  %605 = vmatpush1.bf16.msra.mxu1 %v550_v17  ;;  %v158_v10 = vld [vmem:[%s1051_s0 + $0x168] sm:$0xff]  ;;  %v157_v12 = vld [vmem:[%s1051_s0 + $0x160] sm:$0xff]  ;;  %v128_v13 = vld [vmem:[%s1051_s0 + $0x78] sm:$0xff] }
  0x15   :  { %552 = vmatprep.subr.bf16.mxu0 %v618_v0  ;;  %590 = vmatprep.subr.bf16.mxu1 %v618_v0  ;;  %v160_v14 = vld [vmem:[%s1051_s0 + $0x178] sm:$0xff]  ;;  %v127_v15 = vld [vmem:[%s1051_s0 + $0x70] sm:$0xff]  ;;  %v130_v17 = vld [vmem:[%s1051_s0 + $0x88] sm:$0xff] }
  0x16   :  { %v159_v16 = vld [vmem:[%s1051_s0 + $0x170] sm:$0xff]  ;;  %v162_v18 = vld [vmem:[%s1051_s0 + $0x188] sm:$0xff]  ;;  %v129_v19 = vld [vmem:[%s1051_s0 + $0x80] sm:$0xff] }
  0x17   :  { %v132_v21 = vld [vmem:[%s1051_s0 + $0x98] sm:$0xff]  ;;  %v163_v24 = vld [vmem:[%s1051_s0 + $0x190] sm:$0xff]  ;;  %v134_v25 = vld [vmem:[%s1051_s0 + $0xa8] sm:$0xff] }
  0x18   :  { %554 = vmatpush1.bf16.msra.mxu0 %v553_v20  ;;  %606 = vmatpush1.bf16.msra.mxu1 %v553_v20  ;;  %v161_v20 = vld [vmem:[%s1051_s0 + $0x180] sm:$0xff]  ;;  %v164_v22 = vld [vmem:[%s1051_s0 + $0x198] sm:$0xff]  ;;  %v135_v31 = vld [vmem:[%s1051_s0 + $0xb0] sm:$0xff] }
  0x19   :  { %555 = vmatprep.subr.bf16.mxu0 %v618_v0  ;;  %591 = vmatprep.subr.bf16.mxu1 %v618_v0  ;;  %v133_v27 = vld [vmem:[%s1051_s0 + $0xa0] sm:$0xff]  ;;  %v168_v30 = vld [vmem:[%s1051_s0 + $0x1b8] sm:$0xff]  ;;  %v138_v33 = vld [vmem:[%s1051_s0 + $0xc8] sm:$0xff] }
  0x1a   :  { %v165_v28 = vld [vmem:[%s1051_s0 + $0x1a0] sm:$0xff]  ;;  %v170_v34 = vld [vmem:[%s1051_s0 + $0x1c8] sm:$0xff]  ;;  %v140_v37 = vld [vmem:[%s1051_s0 + $0xd8] sm:$0xff] }
  0x1b   :  { %v169_v36 = vld [vmem:[%s1051_s0 + $0x1c0] sm:$0xff]  ;;  %v139_v39 = vld [vmem:[%s1051_s0 + $0xd0] sm:$0xff]  ;;  %v174_v42 = vld [vmem:[%s1051_s0 + $0x1e8] sm:$0xff] }
  0x1c   :  { %557 = vmatpush1.bf16.msra.mxu0 %v556_v23  ;;  %607 = vmatpush1.bf16.msra.mxu1 %v556_v23  ;;  %v131_v23 = vld [vmem:[%s1051_s0 + $0x90] sm:$0xff]  ;;  %v141_v43 = vld [vmem:[%s1051_s0 + $0xe0] sm:$0xff]  ;;  %v144_v45 = vld [vmem:[%s1051_s0 + $0xf8] sm:$0xff] }
  0x1d   :  { %558 = vmatprep.subr.bf16.mxu0 %v618_v0  ;;  %592 = vmatprep.subr.bf16.mxu1 %v618_v0  ;;  %v171_v40 = vld [vmem:[%s1051_s0 + $0x1d0] sm:$0xff]  ;;  %v176_v46 = vld [vmem:[%s1051_s0 + $0x1f8] sm:$0xff] }
  0x1e   :  { %v175_v48 = vld [vmem:[%s1051_s0 + $0x1f0] sm:$0xff] }
  0x20   :  { %560 = vmatpush1.bf16.msra.mxu0 %v559_v26  ;;  %608 = vmatpush1.bf16.msra.mxu1 %v559_v26  ;;  %v166_v26 = vld [vmem:[%s1051_s0 + $0x1a8] sm:$0xff] }
  0x21   :  { %561 = vmatprep.subr.bf16.mxu0 %v618_v0  ;;  %593 = vmatprep.subr.bf16.mxu1 %v618_v0 }
  0x24   :  { %563 = vmatpush1.bf16.msra.mxu0 %v562_v29  ;;  %609 = vmatpush1.bf16.msra.mxu1 %v562_v29  ;;  %v136_v29 = vld [vmem:[%s1051_s0 + $0xb8] sm:$0xff] }
  0x25   :  { %564 = vmatprep.subr.bf16.mxu0 %v618_v0  ;;  %594 = vmatprep.subr.bf16.mxu1 %v618_v0 }
  0x28   :  { %566 = vmatpush1.bf16.msra.mxu0 %v565_v32  ;;  %610 = vmatpush1.bf16.msra.mxu1 %v565_v32  ;;  %v167_v32 = vld [vmem:[%s1051_s0 + $0x1b0] sm:$0xff] }
  0x29   :  { %567 = vmatprep.subr.bf16.mxu0 %v618_v0  ;;  %595 = vmatprep.subr.bf16.mxu1 %v618_v0 }
  0x2c   :  { %569 = vmatpush1.bf16.msra.mxu0 %v568_v35  ;;  %611 = vmatpush1.bf16.msra.mxu1 %v568_v35  ;;  %v137_v35 = vld [vmem:[%s1051_s0 + $0xc0] sm:$0xff] }
  0x2d   :  { %570 = vmatprep.subr.bf16.mxu0 %v618_v0  ;;  %596 = vmatprep.subr.bf16.mxu1 %v618_v0 }
  0x30   :  { %572 = vmatpush1.bf16.msra.mxu0 %v571_v38  ;;  %612 = vmatpush1.bf16.msra.mxu1 %v571_v38  ;;  %v172_v38 = vld [vmem:[%s1051_s0 + $0x1d8] sm:$0xff] }
  0x31   :  { %573 = vmatprep.subr.bf16.mxu0 %v618_v0  ;;  %597 = vmatprep.subr.bf16.mxu1 %v618_v0 }
  0x34   :  { %575 = vmatpush1.bf16.msra.mxu0 %v574_v41  ;;  %613 = vmatpush1.bf16.msra.mxu1 %v574_v41  ;;  %v142_v41 = vld [vmem:[%s1051_s0 + $0xe8] sm:$0xff] }
  0x35   :  { %576 = vmatprep.subr.bf16.mxu0 %v618_v0  ;;  %598 = vmatprep.subr.bf16.mxu1 %v618_v0 }
  0x38   :  { %578 = vmatpush1.bf16.msra.mxu0 %v577_v44  ;;  %614 = vmatpush1.bf16.msra.mxu1 %v577_v44  ;;  %v173_v44 = vld [vmem:[%s1051_s0 + $0x1e0] sm:$0xff] }
  0x39   :  { %579 = vmatprep.subr.bf16.mxu0 %v618_v0  ;;  %599 = vmatprep.subr.bf16.mxu1 %v618_v0 }
  0x3c   :  { %581 = vmatpush1.bf16.msra.mxu0 %v580_v47  ;;  %615 = vmatpush1.bf16.msra.mxu1 %v580_v47  ;;  %v143_v47 = vld [vmem:[%s1051_s0 + $0xf0] sm:$0xff] }
  0x3d   :  { %582 = vmatprep.subr.bf16.mxu0 %v618_v0  ;;  %600 = vmatprep.subr.bf16.mxu1 %v618_v0  ;;  %v151_v0 = vld [vmem:[%s1051_s0 + $0x130] sm:$0xff] }
  0x40   :  { %584 = vmatpush1.bf16.msra.mxu0 %v583_v50  ;;  %616 = vmatpush1.bf16.msra.mxu1 %v583_v50 }
  0x43   :  { %242 = vmatmul.mubr.f32.vlgmr.msra.gmra.mrb[0].mxu0 %v113_v51  ;;  %322 = vmatmul.mubr.f32.vlgmr.msra.gmra.mrb[0].mxu1 %v145_v52 }
  0x44   :  { %246 = vmatprep.mubr.f32.mxu0 %v116_v53  ;;  %326 = vmatprep.mubr.f32.mxu1 %v148_v54 }
  0x47   :  { %247 = vmatmul.mubr.f32.gmra.mrb[2].mxu0 %v115_v55  ;;  %327 = vmatmul.mubr.f32.gmra.mrb[2].mxu1 %v147_v56 }
  0x48   :  { %251 = vmatprep.mubr.f32.mxu0 %v118_v57  ;;  %331 = vmatprep.mubr.f32.mxu1 %v150_v58 }
  0x4b   :  { %252 = vmatmul.mubr.f32.gmra.mrb[4].mxu0 %v117_v59  ;;  %332 = vmatmul.mubr.f32.gmra.mrb[4].mxu1 %v149_v60 }
  0x4c   :  { %256 = vmatprep.mubr.f32.mxu0 %v120_v61  ;;  %336 = vmatprep.mubr.f32.mxu1 %v152_v62 }
  0x4f   :  { %257 = vmatmul.mubr.f32.gmra.mrb[6].mxu0 %v119_v63  ;;  %337 = vmatmul.mubr.f32.gmra.mrb[6].mxu1 %v151_v0 }
  0x50   :  { %261 = vmatprep.mubr.f32.mxu0 %v122_v1  ;;  %341 = vmatprep.mubr.f32.mxu1 %v154_v2 }
  0x53   :  { %262 = vmatmul.mubr.f32.gmra.mrb[8].mxu0 %v121_v3  ;;  %342 = vmatmul.mubr.f32.gmra.mrb[8].mxu1 %v153_v4 }
  0x54   :  { %266 = vmatprep.mubr.f32.mxu0 %v124_v5  ;;  %346 = vmatprep.mubr.f32.mxu1 %v156_v6 }
  0x57   :  { %267 = vmatmul.mubr.f32.gmra.mrb[10].mxu0 %v123_v7  ;;  %347 = vmatmul.mubr.f32.gmra.mrb[10].mxu1 %v155_v8 }
  0x58   :  { %271 = vmatprep.mubr.f32.mxu0 %v126_v9  ;;  %351 = vmatprep.mubr.f32.mxu1 %v158_v10 }
  0x5b   :  { %272 = vmatmul.mubr.f32.gmra.mrb[12].mxu0 %v125_v11  ;;  %352 = vmatmul.mubr.f32.gmra.mrb[12].mxu1 %v157_v12 }
  0x5c   :  { %276 = vmatprep.mubr.f32.mxu0 %v128_v13  ;;  %356 = vmatprep.mubr.f32.mxu1 %v160_v14 }
  0x5f   :  { %277 = vmatmul.mubr.f32.gmra.mrb[14].mxu0 %v127_v15  ;;  %357 = vmatmul.mubr.f32.gmra.mrb[14].mxu1 %v159_v16 }
  0x60   :  { %281 = vmatprep.mubr.f32.mxu0 %v130_v17  ;;  %361 = vmatprep.mubr.f32.mxu1 %v162_v18 }
  0x63   :  { %282 = vmatmul.mubr.f32.gmra.mrb[16].mxu0 %v129_v19  ;;  %362 = vmatmul.mubr.f32.gmra.mrb[16].mxu1 %v161_v20 }
  0x64   :  { %286 = vmatprep.mubr.f32.mxu0 %v132_v21  ;;  %366 = vmatprep.mubr.f32.mxu1 %v164_v22 }
  0x67   :  { %287 = vmatmul.mubr.f32.gmra.mrb[18].mxu0 %v131_v23  ;;  %367 = vmatmul.mubr.f32.gmra.mrb[18].mxu1 %v163_v24 }
  0x68   :  { %291 = vmatprep.mubr.f32.mxu0 %v134_v25  ;;  %371 = vmatprep.mubr.f32.mxu1 %v166_v26 }
  0x6b   :  { %292 = vmatmul.mubr.f32.gmra.mrb[20].mxu0 %v133_v27  ;;  %372 = vmatmul.mubr.f32.gmra.mrb[20].mxu1 %v165_v28 }
  0x6c   :  { %296 = vmatprep.mubr.f32.mxu0 %v136_v29  ;;  %376 = vmatprep.mubr.f32.mxu1 %v168_v30 }
  0x6f   :  { %297 = vmatmul.mubr.f32.gmra.mrb[22].mxu0 %v135_v31  ;;  %377 = vmatmul.mubr.f32.gmra.mrb[22].mxu1 %v167_v32 }
  0x70   :  { %301 = vmatprep.mubr.f32.mxu0 %v138_v33  ;;  %381 = vmatprep.mubr.f32.mxu1 %v170_v34 }
  0x73   :  { %302 = vmatmul.mubr.f32.gmra.mrb[24].mxu0 %v137_v35  ;;  %382 = vmatmul.mubr.f32.gmra.mrb[24].mxu1 %v169_v36 }
  0x74   :  { %306 = vmatprep.mubr.f32.mxu0 %v140_v37  ;;  %386 = vmatprep.mubr.f32.mxu1 %v172_v38 }
  0x77   :  { %307 = vmatmul.mubr.f32.gmra.mrb[26].mxu0 %v139_v39  ;;  %387 = vmatmul.mubr.f32.gmra.mrb[26].mxu1 %v171_v40 }
  0x78   :  { %311 = vmatprep.mubr.f32.mxu0 %v142_v41  ;;  %391 = vmatprep.mubr.f32.mxu1 %v174_v42 }
  0x7b   :  { %312 = vmatmul.mubr.f32.gmra.mrb[28].mxu0 %v141_v43  ;;  %392 = vmatmul.mubr.f32.gmra.mrb[28].mxu1 %v173_v44 }
  0x7c   :  { %316 = vmatprep.mubr.f32.mxu0 %v144_v45  ;;  %396 = vmatprep.mubr.f32.mxu1 %v176_v46 }
  0x7f   :  { %317 = vmatmul.mubr.f32.gmra.mrb[30].mxu0 %v143_v47  ;;  %397 = vmatmul.mubr.f32.gmra.mrb[30].mxu1 %v175_v48 }
 0x116   :  { %v243_v49 = vpop.f32.mrb[0].mxu0  ;;  %v323_v50 = vpop.f32.mrb[0].mxu1 }
 0x117   :  { %501 = vst [vmem:[%s1052_s2] sm:$0xff] %v243_v49  ;;  %517 = vst [vmem:[%s1052_s2 + $0x80] sm:$0xff] %v323_v50  ;;  %v245_v51 = vpop.f32.mrb[1].mxu0  ;;  %v325_v52 = vpop.f32.mrb[1].mxu1 }
 0x11a   :  { %v248_v53 = vpop.f32.mrb[2].mxu0  ;;  %v328_v54 = vpop.f32.mrb[2].mxu1 }
 0x11b   :  { %502 = vst [vmem:[%s1052_s2 + $0x8] sm:$0xff] %v248_v53  ;;  %518 = vst [vmem:[%s1052_s2 + $0x88] sm:$0xff] %v328_v54  ;;  %v250_v55 = vpop.f32.mrb[3].mxu0  ;;  %v330_v56 = vpop.f32.mrb[3].mxu1 }
 0x11e   :  { %v253_v57 = vpop.f32.mrb[4].mxu0  ;;  %v333_v58 = vpop.f32.mrb[4].mxu1 }
 0x11f   :  { %503 = vst [vmem:[%s1052_s2 + $0x10] sm:$0xff] %v253_v57  ;;  %519 = vst [vmem:[%s1052_s2 + $0x90] sm:$0xff] %v333_v58  ;;  %v255_v59 = vpop.f32.mrb[5].mxu0  ;;  %v335_v60 = vpop.f32.mrb[5].mxu1 }
 0x122   :  { %v258_v61 = vpop.f32.mrb[6].mxu0  ;;  %v338_v62 = vpop.f32.mrb[6].mxu1 }
 0x123   :  { %504 = vst [vmem:[%s1052_s2 + $0x18] sm:$0xff] %v258_v61  ;;  %520 = vst [vmem:[%s1052_s2 + $0x98] sm:$0xff] %v338_v62  ;;  %v260_v63 = vpop.f32.mrb[7].mxu0  ;;  %v340_v0 = vpop.f32.mrb[7].mxu1 }
 0x126   :  { %v263_v1 = vpop.f32.mrb[8].mxu0  ;;  %v343_v2 = vpop.f32.mrb[8].mxu1 }
 0x127   :  { %505 = vst [vmem:[%s1052_s2 + $0x20] sm:$0xff] %v263_v1  ;;  %521 = vst [vmem:[%s1052_s2 + $0xa0] sm:$0xff] %v343_v2  ;;  %v265_v3 = vpop.f32.mrb[9].mxu0  ;;  %v345_v4 = vpop.f32.mrb[9].mxu1 }
 0x12a   :  { %v268_v5 = vpop.f32.mrb[10].mxu0  ;;  %v348_v6 = vpop.f32.mrb[10].mxu1 }
 0x12b   :  { %506 = vst [vmem:[%s1052_s2 + $0x28] sm:$0xff] %v268_v5  ;;  %522 = vst [vmem:[%s1052_s2 + $0xa8] sm:$0xff] %v348_v6  ;;  %v270_v7 = vpop.f32.mrb[11].mxu0  ;;  %v350_v8 = vpop.f32.mrb[11].mxu1 }
 0x12e   :  { %v273_v9 = vpop.f32.mrb[12].mxu0  ;;  %v353_v10 = vpop.f32.mrb[12].mxu1 }
 0x12f   :  { %507 = vst [vmem:[%s1052_s2 + $0x30] sm:$0xff] %v273_v9  ;;  %523 = vst [vmem:[%s1052_s2 + $0xb0] sm:$0xff] %v353_v10  ;;  %v275_v11 = vpop.f32.mrb[13].mxu0  ;;  %v355_v12 = vpop.f32.mrb[13].mxu1 }
 0x132   :  { %v278_v13 = vpop.f32.mrb[14].mxu0  ;;  %v358_v14 = vpop.f32.mrb[14].mxu1 }
 0x133   :  { %508 = vst [vmem:[%s1052_s2 + $0x38] sm:$0xff] %v278_v13  ;;  %524 = vst [vmem:[%s1052_s2 + $0xb8] sm:$0xff] %v358_v14  ;;  %v280_v15 = vpop.f32.mrb[15].mxu0  ;;  %v360_v16 = vpop.f32.mrb[15].mxu1 }
 0x136   :  { %v283_v17 = vpop.f32.mrb[16].mxu0  ;;  %v363_v18 = vpop.f32.mrb[16].mxu1 }
 0x137   :  { %509 = vst [vmem:[%s1052_s2 + $0x40] sm:$0xff] %v283_v17  ;;  %525 = vst [vmem:[%s1052_s2 + $0xc0] sm:$0xff] %v363_v18  ;;  %v285_v19 = vpop.f32.mrb[17].mxu0  ;;  %v365_v20 = vpop.f32.mrb[17].mxu1 }
 0x13a   :  { %v288_v21 = vpop.f32.mrb[18].mxu0  ;;  %v368_v22 = vpop.f32.mrb[18].mxu1 }
 0x13b   :  { %510 = vst [vmem:[%s1052_s2 + $0x48] sm:$0xff] %v288_v21  ;;  %526 = vst [vmem:[%s1052_s2 + $0xc8] sm:$0xff] %v368_v22  ;;  %v290_v23 = vpop.f32.mrb[19].mxu0  ;;  %v370_v24 = vpop.f32.mrb[19].mxu1 }
 0x13e   :  { %v293_v25 = vpop.f32.mrb[20].mxu0  ;;  %v373_v26 = vpop.f32.mrb[20].mxu1 }
 0x13f   :  { %511 = vst [vmem:[%s1052_s2 + $0x50] sm:$0xff] %v293_v25  ;;  %527 = vst [vmem:[%s1052_s2 + $0xd0] sm:$0xff] %v373_v26  ;;  %v295_v27 = vpop.f32.mrb[21].mxu0  ;;  %v375_v28 = vpop.f32.mrb[21].mxu1 }
 0x142   :  { %v298_v29 = vpop.f32.mrb[22].mxu0  ;;  %v378_v30 = vpop.f32.mrb[22].mxu1 }
 0x143   :  { %512 = vst [vmem:[%s1052_s2 + $0x58] sm:$0xff] %v298_v29  ;;  %528 = vst [vmem:[%s1052_s2 + $0xd8] sm:$0xff] %v378_v30  ;;  %v300_v31 = vpop.f32.mrb[23].mxu0  ;;  %v380_v32 = vpop.f32.mrb[23].mxu1 }
 0x146   :  { %v303_v33 = vpop.f32.mrb[24].mxu0  ;;  %v383_v34 = vpop.f32.mrb[24].mxu1 }
 0x147   :  { %513 = vst [vmem:[%s1052_s2 + $0x60] sm:$0xff] %v303_v33  ;;  %529 = vst [vmem:[%s1052_s2 + $0xe0] sm:$0xff] %v383_v34  ;;  %v305_v35 = vpop.f32.mrb[25].mxu0  ;;  %v385_v36 = vpop.f32.mrb[25].mxu1 }
 0x14a   :  { %v308_v37 = vpop.f32.mrb[26].mxu0  ;;  %v388_v38 = vpop.f32.mrb[26].mxu1 }
 0x14b   :  { %514 = vst [vmem:[%s1052_s2 + $0x68] sm:$0xff] %v308_v37  ;;  %530 = vst [vmem:[%s1052_s2 + $0xe8] sm:$0xff] %v388_v38  ;;  %v310_v39 = vpop.f32.mrb[27].mxu0  ;;  %v390_v40 = vpop.f32.mrb[27].mxu1 }
 0x14e   :  { %v313_v41 = vpop.f32.mrb[28].mxu0  ;;  %v393_v42 = vpop.f32.mrb[28].mxu1 }
 0x14f   :  { %515 = vst [vmem:[%s1052_s2 + $0x70] sm:$0xff] %v313_v41  ;;  %531 = vst [vmem:[%s1052_s2 + $0xf0] sm:$0xff] %v393_v42  ;;  %v315_v43 = vpop.f32.mrb[29].mxu0  ;;  %v395_v44 = vpop.f32.mrb[29].mxu1 }
 0x152   :  { %v318_v45 = vpop.f32.mrb[30].mxu0  ;;  %v398_v46 = vpop.f32.mrb[30].mxu1 }
 0x153   :  { %516 = vst [vmem:[%s1052_s2 + $0x78] sm:$0xff] %v318_v45  ;;  %532 = vst [vmem:[%s1052_s2 + $0xf8] sm:$0xff] %v398_v46  ;;  %v320_v47 = vpop.f32.mrb[31].mxu0  ;;  %v400_v48 = vpop.f32.mrb[31].mxu1 }

// kernel: sgc_forward.5
= control target key start
LH: loop header
LB: loop body
LE: loop exit
PB: predicated region body
PF: predicated region fallthrough
CT: control target
= control target key end

     0   :  { %v1613_v0 = vmov 0.0|0.0   ;;  %s2975_s1 = inlined_call_operand.vmem [shape: f32[256,128], index: 1, kind: input, shape index: {}]   ;;  %s2976_s0 = inlined_call_operand.vmem [shape: f32[256,256], index: 0, kind: input, shape index: {}]   ;;  %s2977_s2 = inlined_call_operand.vmem [shape: f32[128,128], index: 2, kind: input, shape index: {}]   ;;  %s2978_s3 = inlined_call_operand.vmem [shape: f32[256,128], index: 3, kind: output, shape index: {0}]   ;;  %s2979_s4 = inlined_call_operand.vmem [shape: f32[256,128], index: 4, kind: output, shape index: {1}]   ;;  %s2980_s5 = inlined_call_operand.vmem [shape: f32[256,128], index: 5, kind: output, shape index: {2}]  }
   0x1   :  { %1371 = vmatprep.subr.bf16.mxu0 %v1613_v0  ;;  %v55_v1 = vld [vmem:[%s2975_s1] sm:$0xff]  ;;  %v56_v2 = vld [vmem:[%s2975_s1 + $0x8] sm:$0xff]  ;;  %v57_v3 = vld [vmem:[%s2975_s1 + $0x10] sm:$0xff]  ;;  %1451 = vmatprep.subr.bf16.mxu1 %v1613_v0 }
   0x2   :  { %v1372_v4 = vpack.c.bf16 %v56_v2, %v55_v1  ;;  %v58_v5 = vld [vmem:[%s2975_s1 + $0x18] sm:$0xff]  ;;  %v59_v7 = vld [vmem:[%s2975_s1 + $0x20] sm:$0xff]  ;;  %v60_v8 = vld [vmem:[%s2975_s1 + $0x28] sm:$0xff] }
   0x3   :  { %v1375_v6 = vpack.c.bf16 %v58_v5, %v57_v3  ;;  %v1378_v9 = vpack.c.bf16 %v60_v8, %v59_v7  ;;  %v61_v10 = vld [vmem:[%s2975_s1 + $0x30] sm:$0xff]  ;;  %v62_v11 = vld [vmem:[%s2975_s1 + $0x38] sm:$0xff]  ;;  %v120_v12 = vld [vmem:[%s2976_s0 + $0x8] sm:$0xff] }
   0x4   :  { %1373 = vmatpush1.bf16.msra.mxu0 %v1372_v4  ;;  %1467 = vmatpush1.bf16.msra.mxu1 %v1372_v4  ;;  %v1381_v13 = vpack.c.bf16 %v62_v11, %v61_v10  ;;  %v63_v14 = vld [vmem:[%s2975_s1 + $0x40] sm:$0xff]  ;;  %v64_v15 = vld [vmem:[%s2975_s1 + $0x48] sm:$0xff]  ;;  %v65_v17 = vld [vmem:[%s2975_s1 + $0x50] sm:$0xff] }
   0x5   :  { %1374 = vmatprep.subr.bf16.mxu0 %v1613_v0  ;;  %1452 = vmatprep.subr.bf16.mxu1 %v1613_v0  ;;  %v1384_v16 = vpack.c.bf16 %v64_v15, %v63_v14  ;;  %v66_v18 = vld [vmem:[%s2975_s1 + $0x58] sm:$0xff]  ;;  %v67_v20 = vld [vmem:[%s2975_s1 + $0x60] sm:$0xff]  ;;  %v68_v21 = vld [vmem:[%s2975_s1 + $0x68] sm:$0xff] }
   0x6   :  { %247 = vmatprep.mubr.f32.mxu0 %v120_v12  ;;  %v1387_v19 = vpack.c.bf16 %v66_v18, %v65_v17  ;;  %v1390_v22 = vpack.c.bf16 %v68_v21, %v67_v20  ;;  %v69_v23 = vld [vmem:[%s2975_s1 + $0x70] sm:$0xff]  ;;  %v70_v24 = vld [vmem:[%s2975_s1 + $0x78] sm:$0xff]  ;;  %v168_v25 = vld [vmem:[%s2976_s0 + $0x188] sm:$0xff] }
   0x7   :  { %367 = vmatprep.mubr.f32.mxu1 %v168_v25  ;;  %v1393_v26 = vpack.c.bf16 %v70_v24, %v69_v23  ;;  %v71_v27 = vld [vmem:[%s2975_s1 + $0x80] sm:$0xff]  ;;  %v72_v28 = vld [vmem:[%s2975_s1 + $0x88] sm:$0xff]  ;;  %v73_v30 = vld [vmem:[%s2975_s1 + $0x90] sm:$0xff] }
   0x8   :  { %1376 = vmatpush1.bf16.msra.mxu0 %v1375_v6  ;;  %1468 = vmatpush1.bf16.msra.mxu1 %v1375_v6  ;;  %v1396_v29 = vpack.c.bf16 %v72_v28, %v71_v27  ;;  %v74_v31 = vld [vmem:[%s2975_s1 + $0x98] sm:$0xff]  ;;  %v75_v33 = vld [vmem:[%s2975_s1 + $0xa0] sm:$0xff]  ;;  %v76_v34 = vld [vmem:[%s2975_s1 + $0xa8] sm:$0xff] }
   0x9   :  { %1377 = vmatprep.subr.bf16.mxu0 %v1613_v0  ;;  %1453 = vmatprep.subr.bf16.mxu1 %v1613_v0  ;;  %v1399_v32 = vpack.c.bf16 %v74_v31, %v73_v30  ;;  %v1402_v35 = vpack.c.bf16 %v76_v34, %v75_v33  ;;  %v77_v36 = vld [vmem:[%s2975_s1 + $0xb0] sm:$0xff]  ;;  %v78_v37 = vld [vmem:[%s2975_s1 + $0xb8] sm:$0xff]  ;;  %v79_v39 = vld [vmem:[%s2975_s1 + $0xc0] sm:$0xff] }
   0xa   :  { %v1405_v38 = vpack.c.bf16 %v78_v37, %v77_v36  ;;  %v80_v40 = vld [vmem:[%s2975_s1 + $0xc8] sm:$0xff]  ;;  %v81_v42 = vld [vmem:[%s2975_s1 + $0xd0] sm:$0xff]  ;;  %v82_v43 = vld [vmem:[%s2975_s1 + $0xd8] sm:$0xff] }
   0xb   :  { %v1408_v41 = vpack.c.bf16 %v80_v40, %v79_v39  ;;  %v1411_v44 = vpack.c.bf16 %v82_v43, %v81_v42  ;;  %v83_v45 = vld [vmem:[%s2975_s1 + $0xe0] sm:$0xff]  ;;  %v84_v46 = vld [vmem:[%s2975_s1 + $0xe8] sm:$0xff]  ;;  %v85_v48 = vld [vmem:[%s2975_s1 + $0xf0] sm:$0xff] }
   0xc   :  { %1379 = vmatpush1.bf16.msra.mxu0 %v1378_v9  ;;  %1469 = vmatpush1.bf16.msra.mxu1 %v1378_v9  ;;  %v1414_v47 = vpack.c.bf16 %v84_v46, %v83_v45  ;;  %v86_v49 = vld [vmem:[%s2975_s1 + $0xf8] sm:$0xff]  ;;  %v507_v50 = vld [vmem:[%s2977_s2] sm:$0xff]  ;;  %v508_v51 = vld [vmem:[%s2977_s2 + $0x8] sm:$0xff] }
   0xd   :  { %1380 = vmatprep.subr.bf16.mxu0 %v1613_v0  ;;  %1454 = vmatprep.subr.bf16.mxu1 %v1613_v0  ;;  %v1417_v52 = vpack.c.bf16 %v86_v49, %v85_v48  ;;  %v1419_v53 = vpack.c.bf16 %v508_v51, %v507_v50  ;;  %v509_v54 = vld [vmem:[%s2977_s2 + $0x10] sm:$0xff]  ;;  %v510_v55 = vld [vmem:[%s2977_s2 + $0x18] sm:$0xff]  ;;  %v119_v56 = vld [vmem:[%s2976_s0] sm:$0xff] }
   0xe   :  { %v122_v57 = vld [vmem:[%s2976_s0 + $0x18] sm:$0xff]  ;;  %v167_v58 = vld [vmem:[%s2976_s0 + $0x180] sm:$0xff]  ;;  %v1423_v60 = vpack.c.bf16 %v510_v55, %v509_v54  ;;  %v512_v62 = vld [vmem:[%s2977_s2 + $0x28] sm:$0xff] }
   0xf   :  { %v170_v59 = vld [vmem:[%s2976_s0 + $0x198] sm:$0xff]  ;;  %v511_v61 = vld [vmem:[%s2977_s2 + $0x20] sm:$0xff]  ;;  %v121_v63 = vld [vmem:[%s2976_s0 + $0x10] sm:$0xff] }
  0x10   :  { %1382 = vmatpush1.bf16.msra.mxu0 %v1381_v13  ;;  %1470 = vmatpush1.bf16.msra.mxu1 %v1381_v13  ;;  %v169_v1 = vld [vmem:[%s2976_s0 + $0x190] sm:$0xff]  ;;  %v172_v2 = vld [vmem:[%s2976_s0 + $0x1a8] sm:$0xff]  ;;  %v1427_v3 = vpack.c.bf16 %v512_v62, %v511_v61  ;;  %v514_v5 = vld [vmem:[%s2977_s2 + $0x38] sm:$0xff] }
  0x11   :  { %1383 = vmatprep.subr.bf16.mxu0 %v1613_v0  ;;  %1455 = vmatprep.subr.bf16.mxu1 %v1613_v0  ;;  %v513_v4 = vld [vmem:[%s2977_s2 + $0x30] sm:$0xff]  ;;  %v123_v6 = vld [vmem:[%s2976_s0 + $0x20] sm:$0xff]  ;;  %v126_v7 = vld [vmem:[%s2976_s0 + $0x38] sm:$0xff] }
  0x12   :  { %v171_v8 = vld [vmem:[%s2976_s0 + $0x1a0] sm:$0xff]  ;;  %v174_v9 = vld [vmem:[%s2976_s0 + $0x1b8] sm:$0xff]  ;;  %v1431_v10 = vpack.c.bf16 %v514_v5, %v513_v4  ;;  %v516_v12 = vld [vmem:[%s2977_s2 + $0x48] sm:$0xff] }
  0x13   :  { %v515_v11 = vld [vmem:[%s2977_s2 + $0x40] sm:$0xff]  ;;  %v125_v13 = vld [vmem:[%s2976_s0 + $0x30] sm:$0xff]  ;;  %v128_v14 = vld [vmem:[%s2976_s0 + $0x48] sm:$0xff] }
  0x14   :  { %1385 = vmatpush1.bf16.msra.mxu0 %v1384_v16  ;;  %1471 = vmatpush1.bf16.msra.mxu1 %v1384_v16  ;;  %v173_v15 = vld [vmem:[%s2976_s0 + $0x1b0] sm:$0xff]  ;;  %v176_v16 = vld [vmem:[%s2976_s0 + $0x1c8] sm:$0xff]  ;;  %v1435_v17 = vpack.c.bf16 %v516_v12, %v515_v11  ;;  %v127_v18 = vld [vmem:[%s2976_s0 + $0x40] sm:$0xff] }
  0x15   :  { %1386 = vmatprep.subr.bf16.mxu0 %v1613_v0  ;;  %1456 = vmatprep.subr.bf16.mxu1 %v1613_v0  ;;  %v175_v20 = vld [vmem:[%s2976_s0 + $0x1c0] sm:$0xff]  ;;  %v178_v21 = vld [vmem:[%s2976_s0 + $0x1d8] sm:$0xff]  ;;  %v132_v23 = vld [vmem:[%s2976_s0 + $0x68] sm:$0xff] }
  0x16   :  { %v177_v24 = vld [vmem:[%s2976_s0 + $0x1d0] sm:$0xff]  ;;  %v180_v25 = vld [vmem:[%s2976_s0 + $0x1e8] sm:$0xff]  ;;  %v134_v27 = vld [vmem:[%s2976_s0 + $0x78] sm:$0xff] }
  0x17   :  { %v179_v28 = vld [vmem:[%s2976_s0 + $0x1e0] sm:$0xff]  ;;  %v133_v30 = vld [vmem:[%s2976_s0 + $0x70] sm:$0xff]  ;;  %v136_v31 = vld [vmem:[%s2976_s0 + $0x88] sm:$0xff] }
  0x18   :  { %1388 = vmatpush1.bf16.msra.mxu0 %v1387_v19  ;;  %1472 = vmatpush1.bf16.msra.mxu1 %v1387_v19  ;;  %v130_v19 = vld [vmem:[%s2976_s0 + $0x58] sm:$0xff]  ;;  %v135_v33 = vld [vmem:[%s2976_s0 + $0x80] sm:$0xff]  ;;  %v140_v36 = vld [vmem:[%s2976_s0 + $0xa8] sm:$0xff] }
  0x19   :  { %1389 = vmatprep.subr.bf16.mxu0 %v1613_v0  ;;  %1457 = vmatprep.subr.bf16.mxu1 %v1613_v0  ;;  %v138_v34 = vld [vmem:[%s2976_s0 + $0x98] sm:$0xff]  ;;  %v139_v37 = vld [vmem:[%s2976_s0 + $0xa0] sm:$0xff]  ;;  %v141_v39 = vld [vmem:[%s2976_s0 + $0xb0] sm:$0xff] }
  0x1a   :  { %v144_v40 = vld [vmem:[%s2976_s0 + $0xc8] sm:$0xff]  ;;  %v146_v42 = vld [vmem:[%s2976_s0 + $0xd8] sm:$0xff]  ;;  %v145_v43 = vld [vmem:[%s2976_s0 + $0xd0] sm:$0xff] }
  0x1b   :  { %v147_v45 = vld [vmem:[%s2976_s0 + $0xe0] sm:$0xff]  ;;  %v150_v46 = vld [vmem:[%s2976_s0 + $0xf8] sm:$0xff]  ;;  %v152_v48 = vld [vmem:[%s2976_s0 + $0x108] sm:$0xff] }
  0x1c   :  { %1391 = vmatpush1.bf16.msra.mxu0 %v1390_v22  ;;  %1473 = vmatpush1.bf16.msra.mxu1 %v1390_v22  ;;  %v129_v22 = vld [vmem:[%s2976_s0 + $0x50] sm:$0xff]  ;;  %v151_v49 = vld [vmem:[%s2976_s0 + $0x100] sm:$0xff]  ;;  %v154_v50 = vld [vmem:[%s2976_s0 + $0x118] sm:$0xff] }
  0x1d   :  { %1392 = vmatprep.subr.bf16.mxu0 %v1613_v0  ;;  %1458 = vmatprep.subr.bf16.mxu1 %v1613_v0  ;;  %v153_v51 = vld [vmem:[%s2976_s0 + $0x110] sm:$0xff]  ;;  %v158_v54 = vld [vmem:[%s2976_s0 + $0x138] sm:$0xff]  ;;  %v519_v62 = vld [vmem:[%s2977_s2 + $0x60] sm:$0xff] }
  0x1e   :  { %v157_v55 = vld [vmem:[%s2976_s0 + $0x130] sm:$0xff]  ;;  %v162_v61 = vld [vmem:[%s2976_s0 + $0x158] sm:$0xff] }
  0x1f   :  { %v522_v4 = vld [vmem:[%s2977_s2 + $0x78] sm:$0xff] }
  0x20   :  { %1394 = vmatpush1.bf16.msra.mxu0 %v1393_v26  ;;  %1474 = vmatpush1.bf16.msra.mxu1 %v1393_v26  ;;  %v131_v26 = vld [vmem:[%s2976_s0 + $0x60] sm:$0xff] }
  0x21   :  { %1395 = vmatprep.subr.bf16.mxu0 %v1613_v0  ;;  %1459 = vmatprep.subr.bf16.mxu1 %v1613_v0 }
  0x24   :  { %1397 = vmatpush1.bf16.msra.mxu0 %v1396_v29  ;;  %1475 = vmatpush1.bf16.msra.mxu1 %v1396_v29  ;;  %v182_v29 = vld [vmem:[%s2976_s0 + $0x1f8] sm:$0xff] }
  0x25   :  { %1398 = vmatprep.subr.bf16.mxu0 %v1613_v0  ;;  %1460 = vmatprep.subr.bf16.mxu1 %v1613_v0 }
  0x28   :  { %1400 = vmatpush1.bf16.msra.mxu0 %v1399_v32  ;;  %1476 = vmatpush1.bf16.msra.mxu1 %v1399_v32  ;;  %v181_v32 = vld [vmem:[%s2976_s0 + $0x1f0] sm:$0xff] }
  0x29   :  { %1401 = vmatprep.subr.bf16.mxu0 %v1613_v0  ;;  %1461 = vmatprep.subr.bf16.mxu1 %v1613_v0 }
  0x2c   :  { %1403 = vmatpush1.bf16.msra.mxu0 %v1402_v35  ;;  %1477 = vmatpush1.bf16.msra.mxu1 %v1402_v35  ;;  %v137_v35 = vld [vmem:[%s2976_s0 + $0x90] sm:$0xff] }
  0x2d   :  { %1404 = vmatprep.subr.bf16.mxu0 %v1613_v0  ;;  %1462 = vmatprep.subr.bf16.mxu1 %v1613_v0 }
  0x30   :  { %1406 = vmatpush1.bf16.msra.mxu0 %v1405_v38  ;;  %1478 = vmatpush1.bf16.msra.mxu1 %v1405_v38  ;;  %v142_v38 = vld [vmem:[%s2976_s0 + $0xb8] sm:$0xff] }
  0x31   :  { %1407 = vmatprep.subr.bf16.mxu0 %v1613_v0  ;;  %1463 = vmatprep.subr.bf16.mxu1 %v1613_v0 }
  0x34   :  { %1409 = vmatpush1.bf16.msra.mxu0 %v1408_v41  ;;  %1479 = vmatpush1.bf16.msra.mxu1 %v1408_v41  ;;  %v143_v41 = vld [vmem:[%s2976_s0 + $0xc0] sm:$0xff] }
  0x35   :  { %1410 = vmatprep.subr.bf16.mxu0 %v1613_v0  ;;  %1464 = vmatprep.subr.bf16.mxu1 %v1613_v0 }
  0x38   :  { %1412 = vmatpush1.bf16.msra.mxu0 %v1411_v44  ;;  %1480 = vmatpush1.bf16.msra.mxu1 %v1411_v44  ;;  %v148_v44 = vld [vmem:[%s2976_s0 + $0xe8] sm:$0xff] }
  0x39   :  { %1413 = vmatprep.subr.bf16.mxu0 %v1613_v0  ;;  %1465 = vmatprep.subr.bf16.mxu1 %v1613_v0 }
  0x3c   :  { %1415 = vmatpush1.bf16.msra.mxu0 %v1414_v47  ;;  %1481 = vmatpush1.bf16.msra.mxu1 %v1414_v47  ;;  %v149_v47 = vld [vmem:[%s2976_s0 + $0xf0] sm:$0xff] }
  0x3d   :  { %1416 = vmatprep.subr.bf16.mxu0 %v1613_v0  ;;  %1466 = vmatprep.subr.bf16.mxu1 %v1613_v0  ;;  %v124_v0 = vld [vmem:[%s2976_s0 + $0x28] sm:$0xff] }
  0x40   :  { %1418 = vmatpush1.bf16.msra.mxu0 %v1417_v52  ;;  %1482 = vmatpush1.bf16.msra.mxu1 %v1417_v52  ;;  %v156_v52 = vld [vmem:[%s2976_s0 + $0x128] sm:$0xff] }
  0x41   :  { %1420 = vmatprep.subr.bf16.mxu1 %v1419_v53 }
  0x43   :  { %248 = vmatmul.mubr.f32.vlgmr.msra.gmra.mrb[0].mxu0 %v119_v56  ;;  %368 = vmatmul.mubr.f32.vlgmr.msra.gmra.mrb[0].mxu1 %v167_v58  ;;  %v160_v56 = vld [vmem:[%s2976_s0 + $0x148] sm:$0xff]  ;;  %v518_v58 = vld [vmem:[%s2977_s2 + $0x58] sm:$0xff] }
  0x44   :  { %252 = vmatprep.mubr.f32.mxu0 %v122_v57  ;;  %372 = vmatprep.mubr.f32.mxu1 %v170_v59  ;;  %v517_v57 = vld [vmem:[%s2977_s2 + $0x50] sm:$0xff] }
  0x45   :  { %1422 = vmatpush3.bf16.msra.mxu1 %v1419_v53  ;;  %v155_v53 = vld [vmem:[%s2976_s0 + $0x120] sm:$0xff]  ;;  %v1439_v59 = vpack.c.bf16 %v518_v58, %v517_v57 }
  0x46   :  { %1424 = vmatprep.subr.bf16.mxu1 %v1423_v60 }
  0x47   :  { %253 = vmatmul.mubr.f32.gmra.mrb[2].mxu0 %v121_v63  ;;  %373 = vmatmul.mubr.f32.gmra.mrb[2].mxu1 %v169_v1  ;;  %v520_v63 = vld [vmem:[%s2977_s2 + $0x68] sm:$0xff]  ;;  %v161_v1 = vld [vmem:[%s2976_s0 + $0x150] sm:$0xff] }
  0x48   :  { %257 = vmatprep.mubr.f32.mxu0 %v124_v0  ;;  %377 = vmatprep.mubr.f32.mxu1 %v172_v2  ;;  %v1443_v0 = vpack.c.bf16 %v520_v63, %v519_v62  ;;  %v164_v2 = vld [vmem:[%s2976_s0 + $0x168] sm:$0xff] }
  0x49   :  { %1426 = vmatpush3.bf16.msra.mxu1 %v1423_v60  ;;  %v159_v60 = vld [vmem:[%s2976_s0 + $0x140] sm:$0xff] }
  0x4a   :  { %1428 = vmatprep.subr.bf16.mxu1 %v1427_v3 }
  0x4b   :  { %258 = vmatmul.mubr.f32.gmra.mrb[4].mxu0 %v123_v6  ;;  %378 = vmatmul.mubr.f32.gmra.mrb[4].mxu1 %v171_v8  ;;  %v163_v6 = vld [vmem:[%s2976_s0 + $0x160] sm:$0xff]  ;;  %v165_v8 = vld [vmem:[%s2976_s0 + $0x170] sm:$0xff] }
  0x4c   :  { %262 = vmatprep.mubr.f32.mxu0 %v126_v7  ;;  %382 = vmatprep.mubr.f32.mxu1 %v174_v9  ;;  %v166_v7 = vld [vmem:[%s2976_s0 + $0x178] sm:$0xff] }
  0x4d   :  { %1430 = vmatpush3.bf16.msra.mxu1 %v1427_v3  ;;  %v521_v3 = vld [vmem:[%s2977_s2 + $0x70] sm:$0xff] }
  0x4e   :  { %1432 = vmatprep.subr.bf16.mxu1 %v1431_v10  ;;  %v1447_v5 = vpack.c.bf16 %v522_v4, %v521_v3 }
  0x4f   :  { %263 = vmatmul.mubr.f32.gmra.mrb[6].mxu0 %v125_v13  ;;  %383 = vmatmul.mubr.f32.gmra.mrb[6].mxu1 %v173_v15 }
  0x50   :  { %267 = vmatprep.mubr.f32.mxu0 %v128_v14  ;;  %387 = vmatprep.mubr.f32.mxu1 %v176_v16 }
  0x51   :  { %1434 = vmatpush3.bf16.msra.mxu1 %v1431_v10 }
  0x52   :  { %1436 = vmatprep.subr.bf16.mxu1 %v1435_v17 }
  0x53   :  { %268 = vmatmul.mubr.f32.gmra.mrb[8].mxu0 %v127_v18  ;;  %388 = vmatmul.mubr.f32.gmra.mrb[8].mxu1 %v175_v20 }
  0x54   :  { %272 = vmatprep.mubr.f32.mxu0 %v130_v19  ;;  %392 = vmatprep.mubr.f32.mxu1 %v178_v21 }
  0x55   :  { %1438 = vmatpush3.bf16.msra.mxu1 %v1435_v17 }
  0x56   :  { %1440 = vmatprep.subr.bf16.mxu1 %v1439_v59 }
  0x57   :  { %273 = vmatmul.mubr.f32.gmra.mrb[10].mxu0 %v129_v22  ;;  %393 = vmatmul.mubr.f32.gmra.mrb[10].mxu1 %v177_v24 }
  0x58   :  { %277 = vmatprep.mubr.f32.mxu0 %v132_v23  ;;  %397 = vmatprep.mubr.f32.mxu1 %v180_v25 }
  0x59   :  { %1442 = vmatpush3.bf16.msra.mxu1 %v1439_v59 }
  0x5a   :  { %1444 = vmatprep.subr.bf16.mxu1 %v1443_v0 }
  0x5b   :  { %278 = vmatmul.mubr.f32.gmra.mrb[12].mxu0 %v131_v26  ;;  %398 = vmatmul.mubr.f32.gmra.mrb[12].mxu1 %v179_v28 }
  0x5c   :  { %282 = vmatprep.mubr.f32.mxu0 %v134_v27  ;;  %402 = vmatprep.mubr.f32.mxu1 %v182_v29 }
  0x5d   :  { %1446 = vmatpush3.bf16.msra.mxu1 %v1443_v0 }
  0x5e   :  { %1448 = vmatprep.subr.bf16.mxu1 %v1447_v5 }
  0x5f   :  { %283 = vmatmul.mubr.f32.gmra.mrb[14].mxu0 %v133_v30  ;;  %403 = vmatmul.mubr.f32.gmra.mrb[14].mxu1 %v181_v32 }
  0x60   :  { %287 = vmatprep.mubr.f32.mxu0 %v136_v31 }
  0x61   :  { %1450 = vmatpush3.bf16.msra.mxu1 %v1447_v5 }
  0x63   :  { %288 = vmatmul.mubr.f32.gmra.mrb[16].mxu0 %v135_v33 }
  0x64   :  { %292 = vmatprep.mubr.f32.mxu0 %v138_v34 }
  0x67   :  { %293 = vmatmul.mubr.f32.gmra.mrb[18].mxu0 %v137_v35 }
  0x68   :  { %297 = vmatprep.mubr.f32.mxu0 %v140_v36 }
  0x6b   :  { %298 = vmatmul.mubr.f32.gmra.mrb[20].mxu0 %v139_v37 }
  0x6c   :  { %302 = vmatprep.mubr.f32.mxu0 %v142_v38 }
  0x6f   :  { %303 = vmatmul.mubr.f32.gmra.mrb[22].mxu0 %v141_v39 }
  0x70   :  { %307 = vmatprep.mubr.f32.mxu0 %v144_v40 }
  0x73   :  { %308 = vmatmul.mubr.f32.gmra.mrb[24].mxu0 %v143_v41 }
  0x74   :  { %312 = vmatprep.mubr.f32.mxu0 %v146_v42 }
  0x77   :  { %313 = vmatmul.mubr.f32.gmra.mrb[26].mxu0 %v145_v43 }
  0x78   :  { %317 = vmatprep.mubr.f32.mxu0 %v148_v44 }
  0x7b   :  { %318 = vmatmul.mubr.f32.gmra.mrb[28].mxu0 %v147_v45 }
  0x7c   :  { %322 = vmatprep.mubr.f32.mxu0 %v150_v46 }
  0x7f   :  { %323 = vmatmul.mubr.f32.gmra.mrb[30].mxu0 %v149_v47 }
  0x80   :  { %327 = vmatprep.mubr.f32.mxu0 %v152_v48 }
  0x83   :  { %328 = vmatmul.mubr.f32.gmra.mrb[32].mxu0 %v151_v49 }
  0x84   :  { %332 = vmatprep.mubr.f32.mxu0 %v154_v50 }
  0x87   :  { %333 = vmatmul.mubr.f32.gmra.mrb[34].mxu0 %v153_v51 }
  0x88   :  { %337 = vmatprep.mubr.f32.mxu0 %v156_v52 }
  0x8b   :  { %338 = vmatmul.mubr.f32.gmra.mrb[36].mxu0 %v155_v53 }
  0x8c   :  { %342 = vmatprep.mubr.f32.mxu0 %v158_v54 }
  0x8f   :  { %343 = vmatmul.mubr.f32.gmra.mrb[38].mxu0 %v157_v55 }
  0x90   :  { %347 = vmatprep.mubr.f32.mxu0 %v160_v56 }
  0x93   :  { %348 = vmatmul.mubr.f32.gmra.mrb[40].mxu0 %v159_v60 }
  0x94   :  { %352 = vmatprep.mubr.f32.mxu0 %v162_v61 }
  0x97   :  { %353 = vmatmul.mubr.f32.gmra.mrb[42].mxu0 %v161_v1 }
  0x98   :  { %357 = vmatprep.mubr.f32.mxu0 %v164_v2 }
  0x9b   :  { %358 = vmatmul.mubr.f32.gmra.mrb[44].mxu0 %v163_v6 }
  0x9c   :  { %362 = vmatprep.mubr.f32.mxu0 %v166_v7 }
  0x9f   :  { %363 = vmatmul.mubr.f32.gmra.mrb[46].mxu0 %v165_v8 }
 0x116   :  { %v249_v9 = vpop.f32.mrb[0].mxu0  ;;  %v2012_v11 = vpop.f32.mrb[0].mxu1 }
 0x117   :  { %v251_v10 = vpop.f32.mrb[1].mxu0  ;;  %v371_v12 = vpop.f32.mrb[1].mxu1  ;;  %440 = vst [vmem:[%s2978_s3] sm:$0xff] %v249_v9  ;;  %1323 = vmatprep.mubr.f32.mxu1 %v249_v9  ;;  %464 = vst [vmem:[%s2978_s3 + $0xc0] sm:$0xff] %v2012_v11  ;;  %v780_v9 = vlaneseq }
 0x119   :  { %v2140_v10 = vand.u32 127, %v780_v9 }
 0x11a   :  { %v254_v13 = vpop.f32.mrb[2].mxu0  ;;  %v2021_v15 = vpop.f32.mrb[2].mxu1 }
 0x11b   :  { %v256_v14 = vpop.f32.mrb[3].mxu0  ;;  %v376_v16 = vpop.f32.mrb[3].mxu1  ;;  %441 = vst [vmem:[%s2978_s3 + $0x8] sm:$0xff] %v254_v13  ;;  %1324 = vmatmul.mubr.f32.vlgmr.msra.gmra.mrb[16].mxu1 %v254_v13  ;;  %465 = vst [vmem:[%s2978_s3 + $0xc8] sm:$0xff] %v2021_v15  ;;  %vm782_vm0 = vcmp.lt.s32.totalorder %v2140_v10, 16 }
 0x11e   :  { %v259_v17 = vpop.f32.mrb[4].mxu0  ;;  %v2030_v19 = vpop.f32.mrb[4].mxu1 }
 0x11f   :  { %v261_v18 = vpop.f32.mrb[5].mxu0  ;;  %v381_v20 = vpop.f32.mrb[5].mxu1  ;;  %442 = vst [vmem:[%s2978_s3 + $0x10] sm:$0xff] %v259_v17  ;;  %1326 = vmatprep.mubr.f32.mxu1 %v259_v17  ;;  %466 = vst [vmem:[%s2978_s3 + $0xd0] sm:$0xff] %v2030_v19 }
 0x122   :  { %v264_v21 = vpop.f32.mrb[6].mxu0  ;;  %v2039_v23 = vpop.f32.mrb[6].mxu1 }
 0x123   :  { %v266_v22 = vpop.f32.mrb[7].mxu0  ;;  %v386_v24 = vpop.f32.mrb[7].mxu1  ;;  %443 = vst [vmem:[%s2978_s3 + $0x18] sm:$0xff] %v264_v21  ;;  %1327 = vmatmul.mubr.f32.gmra.mrb[18].mxu1 %v264_v21  ;;  %467 = vst [vmem:[%s2978_s3 + $0xd8] sm:$0xff] %v2039_v23 }
 0x126   :  { %v269_v25 = vpop.f32.mrb[8].mxu0  ;;  %v2048_v27 = vpop.f32.mrb[8].mxu1 }
 0x127   :  { %v271_v26 = vpop.f32.mrb[9].mxu0  ;;  %v391_v28 = vpop.f32.mrb[9].mxu1  ;;  %444 = vst [vmem:[%s2978_s3 + $0x20] sm:$0xff] %v269_v25  ;;  %1329 = vmatprep.mubr.f32.mxu1 %v269_v25  ;;  %468 = vst [vmem:[%s2978_s3 + $0xe0] sm:$0xff] %v2048_v27 }
 0x12a   :  { %v274_v29 = vpop.f32.mrb[10].mxu0  ;;  %v2057_v31 = vpop.f32.mrb[10].mxu1 }
 0x12b   :  { %v276_v30 = vpop.f32.mrb[11].mxu0  ;;  %v396_v32 = vpop.f32.mrb[11].mxu1  ;;  %445 = vst [vmem:[%s2978_s3 + $0x28] sm:$0xff] %v274_v29  ;;  %1330 = vmatmul.mubr.f32.gmra.mrb[20].mxu1 %v274_v29  ;;  %469 = vst [vmem:[%s2978_s3 + $0xe8] sm:$0xff] %v2057_v31 }
 0x12e   :  { %v279_v33 = vpop.f32.mrb[12].mxu0  ;;  %v2066_v35 = vpop.f32.mrb[12].mxu1 }
 0x12f   :  { %v281_v34 = vpop.f32.mrb[13].mxu0  ;;  %v401_v36 = vpop.f32.mrb[13].mxu1  ;;  %446 = vst [vmem:[%s2978_s3 + $0x30] sm:$0xff] %v279_v33  ;;  %1332 = vmatprep.mubr.f32.mxu1 %v279_v33  ;;  %470 = vst [vmem:[%s2978_s3 + $0xf0] sm:$0xff] %v2066_v35 }
 0x132   :  { %v284_v37 = vpop.f32.mrb[14].mxu0  ;;  %v2075_v39 = vpop.f32.mrb[14].mxu1 }
 0x133   :  { %v286_v38 = vpop.f32.mrb[15].mxu0  ;;  %v406_v40 = vpop.f32.mrb[15].mxu1  ;;  %447 = vst [vmem:[%s2978_s3 + $0x38] sm:$0xff] %v284_v37  ;;  %1333 = vmatmul.mubr.f32.gmra.mrb[22].mxu1 %v284_v37  ;;  %471 = vst [vmem:[%s2978_s3 + $0xf8] sm:$0xff] %v2075_v39 }
 0x136   :  { %v289_v41 = vpop.f32.mrb[16].mxu0 }
 0x137   :  { %v291_v42 = vpop.f32.mrb[17].mxu0  ;;  %448 = vst [vmem:[%s2978_s3 + $0x40] sm:$0xff] %v289_v41  ;;  %1335 = vmatprep.mubr.f32.mxu1 %v289_v41 }
 0x13a   :  { %v294_v43 = vpop.f32.mrb[18].mxu0 }
 0x13b   :  { %v296_v44 = vpop.f32.mrb[19].mxu0  ;;  %449 = vst [vmem:[%s2978_s3 + $0x48] sm:$0xff] %v294_v43  ;;  %1336 = vmatmul.mubr.f32.gmra.mrb[24].mxu1 %v294_v43 }
 0x13e   :  { %v299_v45 = vpop.f32.mrb[20].mxu0 }
 0x13f   :  { %v301_v46 = vpop.f32.mrb[21].mxu0  ;;  %450 = vst [vmem:[%s2978_s3 + $0x50] sm:$0xff] %v299_v45  ;;  %1338 = vmatprep.mubr.f32.mxu1 %v299_v45 }
 0x142   :  { %v304_v47 = vpop.f32.mrb[22].mxu0 }
 0x143   :  { %v306_v48 = vpop.f32.mrb[23].mxu0  ;;  %451 = vst [vmem:[%s2978_s3 + $0x58] sm:$0xff] %v304_v47  ;;  %1339 = vmatmul.mubr.f32.gmra.mrb[26].mxu1 %v304_v47 }
 0x146   :  { %v309_v49 = vpop.f32.mrb[24].mxu0 }
 0x147   :  { %v311_v50 = vpop.f32.mrb[25].mxu0  ;;  %452 = vst [vmem:[%s2978_s3 + $0x60] sm:$0xff] %v309_v49  ;;  %1341 = vmatprep.mubr.f32.mxu1 %v309_v49 }
 0x14a   :  { %v314_v51 = vpop.f32.mrb[26].mxu0 }
 0x14b   :  { %v316_v52 = vpop.f32.mrb[27].mxu0  ;;  %453 = vst [vmem:[%s2978_s3 + $0x68] sm:$0xff] %v314_v51  ;;  %1342 = vmatmul.mubr.f32.gmra.mrb[28].mxu1 %v314_v51 }
 0x14e   :  { %v319_v53 = vpop.f32.mrb[28].mxu0 }
 0x14f   :  { %v321_v54 = vpop.f32.mrb[29].mxu0  ;;  %454 = vst [vmem:[%s2978_s3 + $0x70] sm:$0xff] %v319_v53  ;;  %1344 = vmatprep.mubr.f32.mxu1 %v319_v53 }
 0x152   :  { %v324_v55 = vpop.f32.mrb[30].mxu0 }
 0x153   :  { %v326_v56 = vpop.f32.mrb[31].mxu0  ;;  %455 = vst [vmem:[%s2978_s3 + $0x78] sm:$0xff] %v324_v55  ;;  %1345 = vmatmul.mubr.f32.gmra.mrb[30].mxu1 %v324_v55 }
 0x156   :  { %v329_v57 = vpop.f32.mrb[32].mxu0 }
 0x157   :  { %v331_v58 = vpop.f32.mrb[33].mxu0  ;;  %456 = vst [vmem:[%s2978_s3 + $0x80] sm:$0xff] %v329_v57  ;;  %1347 = vmatprep.mubr.f32.mxu1 %v329_v57 }
 0x15a   :  { %v334_v59 = vpop.f32.mrb[34].mxu0 }
 0x15b   :  { %v336_v60 = vpop.f32.mrb[35].mxu0  ;;  %457 = vst [vmem:[%s2978_s3 + $0x88] sm:$0xff] %v334_v59  ;;  %1348 = vmatmul.mubr.f32.gmra.mrb[32].mxu1 %v334_v59 }
 0x15e   :  { %v339_v61 = vpop.f32.mrb[36].mxu0 }
 0x15f   :  { %v341_v62 = vpop.f32.mrb[37].mxu0  ;;  %458 = vst [vmem:[%s2978_s3 + $0x90] sm:$0xff] %v339_v61  ;;  %1350 = vmatprep.mubr.f32.mxu1 %v339_v61 }
 0x162   :  { %v344_v63 = vpop.f32.mrb[38].mxu0 }
 0x163   :  { %v346_v0 = vpop.f32.mrb[39].mxu0  ;;  %459 = vst [vmem:[%s2978_s3 + $0x98] sm:$0xff] %v344_v63  ;;  %1351 = vmatmul.mubr.f32.gmra.mrb[34].mxu1 %v344_v63 }
 0x166   :  { %v349_v1 = vpop.f32.mrb[40].mxu0 }
 0x167   :  { %v351_v2 = vpop.f32.mrb[41].mxu0  ;;  %460 = vst [vmem:[%s2978_s3 + $0xa0] sm:$0xff] %v349_v1  ;;  %1353 = vmatprep.mubr.f32.mxu1 %v349_v1 }
 0x16a   :  { %v354_v3 = vpop.f32.mrb[42].mxu0 }
 0x16b   :  { %v356_v4 = vpop.f32.mrb[43].mxu0  ;;  %461 = vst [vmem:[%s2978_s3 + $0xa8] sm:$0xff] %v354_v3  ;;  %1354 = vmatmul.mubr.f32.gmra.mrb[36].mxu1 %v354_v3 }
 0x16e   :  { %v359_v5 = vpop.f32.mrb[44].mxu0 }
 0x16f   :  { %v361_v6 = vpop.f32.mrb[45].mxu0  ;;  %462 = vst [vmem:[%s2978_s3 + $0xb0] sm:$0xff] %v359_v5  ;;  %1356 = vmatprep.mubr.f32.mxu1 %v359_v5 }
 0x172   :  { %v364_v7 = vpop.f32.mrb[46].mxu0 }
 0x173   :  { %v366_v8 = vpop.f32.mrb[47].mxu0  ;;  %463 = vst [vmem:[%s2978_s3 + $0xb8] sm:$0xff] %v364_v7  ;;  %1357 = vmatmul.mubr.f32.gmra.mrb[38].mxu1 %v364_v7 }
 0x174   :  { %1359 = vmatprep.mubr.f32.mxu1 %v2012_v11 }
 0x177   :  { %1360 = vmatmul.mubr.f32.gmra.mrb[40].mxu1 %v2021_v15 }
 0x178   :  { %1362 = vmatprep.mubr.f32.mxu1 %v2030_v19 }
 0x17b   :  { %1363 = vmatmul.mubr.f32.gmra.mrb[42].mxu1 %v2039_v23 }
 0x17c   :  { %1365 = vmatprep.mubr.f32.mxu1 %v2048_v27 }
 0x17f   :  { %1366 = vmatmul.mubr.f32.gmra.mrb[44].mxu1 %v2057_v31 }
 0x180   :  { %1368 = vmatprep.mubr.f32.mxu1 %v2066_v35 }
 0x183   :  { %1369 = vmatmul.mubr.f32.gmra.mrb[46].mxu1 %v2075_v39 }
 0x1ee   :  { %v2143_v11 = vpop.f32.mrb[16].mxu1 }
 0x1ef   :  { %749 = vst [vmem:[%s2979_s4 + $0x8] sm:$0xff] %v2143_v11  ;;  %v2149_v12 = vpop.f32.mrb[17].mxu1  ;;  %v2154_v13 = vsel %vm782_vm0, %v2143_v11, -inf }
 0x1f0   :  { %748 = vst [vmem:[%s2979_s4] sm:$0xff] %v2149_v12  ;;  %817 = vmax.xlane.f32.xlu0 %v2154_v13  ;;  %v2164_v14 = vsel %vm782_vm0, %v2149_v12, -inf }
 0x1f4   :  { %815 = vmax.xlane.f32.xlu0 %v2164_v14 }
 0x1f6   :  { %v2167_v15 = vpop.f32.mrb[18].mxu1 }
 0x1f7   :  { %751 = vst [vmem:[%s2979_s4 + $0x18] sm:$0xff] %v2167_v15  ;;  %v2173_v16 = vpop.f32.mrb[19].mxu1  ;;  %v2178_v17 = vsel %vm782_vm0, %v2167_v15, -inf }
 0x1f8   :  { %750 = vst [vmem:[%s2979_s4 + $0x10] sm:$0xff] %v2173_v16  ;;  %821 = vmax.xlane.f32.xlu1 %v2178_v17  ;;  %v2188_v18 = vsel %vm782_vm0, %v2173_v16, -inf }
 0x1fc   :  { %819 = vmax.xlane.f32.xlu1 %v2188_v18 }
 0x1fe   :  { %v2191_v19 = vpop.f32.mrb[20].mxu1 }
 0x1ff   :  { %753 = vst [vmem:[%s2979_s4 + $0x28] sm:$0xff] %v2191_v19  ;;  %v2197_v20 = vpop.f32.mrb[21].mxu1  ;;  %v2202_v21 = vsel %vm782_vm0, %v2191_v19, -inf }
 0x200   :  { %752 = vst [vmem:[%s2979_s4 + $0x20] sm:$0xff] %v2197_v20  ;;  %825 = vmax.xlane.f32.xlu1 %v2202_v21  ;;  %v2212_v22 = vsel %vm782_vm0, %v2197_v20, -inf }
 0x201   :  { %823 = vmax.xlane.f32.xlu0 %v2212_v22 }
 0x206   :  { %v2215_v23 = vpop.f32.mrb[22].mxu1 }
 0x207   :  { %755 = vst [vmem:[%s2979_s4 + $0x38] sm:$0xff] %v2215_v23  ;;  %v2221_v24 = vpop.f32.mrb[23].mxu1  ;;  %v2226_v25 = vsel %vm782_vm0, %v2215_v23, -inf }
 0x208   :  { %754 = vst [vmem:[%s2979_s4 + $0x30] sm:$0xff] %v2221_v24  ;;  %829 = vmax.xlane.f32.xlu1 %v2226_v25  ;;  %v2236_v26 = vsel %vm782_vm0, %v2221_v24, -inf }
 0x209   :  { %827 = vmax.xlane.f32.xlu0 %v2236_v26 }
 0x20e   :  { %v2239_v27 = vpop.f32.mrb[24].mxu1 }
 0x20f   :  { %757 = vst [vmem:[%s2979_s4 + $0x48] sm:$0xff] %v2239_v27  ;;  %v2245_v28 = vpop.f32.mrb[25].mxu1  ;;  %v2250_v29 = vsel %vm782_vm0, %v2239_v27, -inf }
 0x210   :  { %756 = vst [vmem:[%s2979_s4 + $0x40] sm:$0xff] %v2245_v28  ;;  %833 = vmax.xlane.f32.xlu1 %v2250_v29  ;;  %v2260_v30 = vsel %vm782_vm0, %v2245_v28, -inf }
 0x211   :  { %831 = vmax.xlane.f32.xlu0 %v2260_v30 }
 0x216   :  { %v2263_v31 = vpop.f32.mrb[26].mxu1 }
 0x217   :  { %759 = vst [vmem:[%s2979_s4 + $0x58] sm:$0xff] %v2263_v31  ;;  %v2269_v32 = vpop.f32.mrb[27].mxu1  ;;  %v2274_v33 = vsel %vm782_vm0, %v2263_v31, -inf }
 0x218   :  { %758 = vst [vmem:[%s2979_s4 + $0x50] sm:$0xff] %v2269_v32  ;;  %837 = vmax.xlane.f32.xlu1 %v2274_v33  ;;  %v2284_v34 = vsel %vm782_vm0, %v2269_v32, -inf }
 0x219   :  { %835 = vmax.xlane.f32.xlu0 %v2284_v34 }
 0x21e   :  { %v2287_v35 = vpop.f32.mrb[28].mxu1 }
 0x21f   :  { %761 = vst [vmem:[%s2979_s4 + $0x68] sm:$0xff] %v2287_v35  ;;  %v2293_v36 = vpop.f32.mrb[29].mxu1  ;;  %v2298_v37 = vsel %vm782_vm0, %v2287_v35, -inf }
 0x220   :  { %760 = vst [vmem:[%s2979_s4 + $0x60] sm:$0xff] %v2293_v36  ;;  %841 = vmax.xlane.f32.xlu1 %v2298_v37  ;;  %v2308_v38 = vsel %vm782_vm0, %v2293_v36, -inf }
 0x221   :  { %839 = vmax.xlane.f32.xlu0 %v2308_v38 }
 0x226   :  { %v2311_v39 = vpop.f32.mrb[30].mxu1 }
 0x227   :  { %763 = vst [vmem:[%s2979_s4 + $0x78] sm:$0xff] %v2311_v39  ;;  %v2317_v40 = vpop.f32.mrb[31].mxu1  ;;  %v2322_v41 = vsel %vm782_vm0, %v2311_v39, -inf }
 0x228   :  { %762 = vst [vmem:[%s2979_s4 + $0x70] sm:$0xff] %v2317_v40  ;;  %845 = vmax.xlane.f32.xlu1 %v2322_v41  ;;  %v2332_v42 = vsel %vm782_vm0, %v2317_v40, -inf }
 0x229   :  { %843 = vmax.xlane.f32.xlu0 %v2332_v42 }
 0x22e   :  { %v2335_v43 = vpop.f32.mrb[32].mxu1 }
 0x22f   :  { %765 = vst [vmem:[%s2979_s4 + $0x88] sm:$0xff] %v2335_v43  ;;  %v2341_v44 = vpop.f32.mrb[33].mxu1  ;;  %v2346_v45 = vsel %vm782_vm0, %v2335_v43, -inf }
 0x230   :  { %764 = vst [vmem:[%s2979_s4 + $0x80] sm:$0xff] %v2341_v44  ;;  %849 = vmax.xlane.f32.xlu1 %v2346_v45  ;;  %v2356_v46 = vsel %vm782_vm0, %v2341_v44, -inf }
 0x231   :  { %847 = vmax.xlane.f32.xlu0 %v2356_v46 }
 0x236   :  { %v2359_v47 = vpop.f32.mrb[34].mxu1 }
 0x237   :  { %767 = vst [vmem:[%s2979_s4 + $0x98] sm:$0xff] %v2359_v47  ;;  %v2365_v48 = vpop.f32.mrb[35].mxu1  ;;  %v2370_v49 = vsel %vm782_vm0, %v2359_v47, -inf }
 0x238   :  { %766 = vst [vmem:[%s2979_s4 + $0x90] sm:$0xff] %v2365_v48  ;;  %853 = vmax.xlane.f32.xlu1 %v2370_v49  ;;  %v2380_v50 = vsel %vm782_vm0, %v2365_v48, -inf }
 0x239   :  { %851 = vmax.xlane.f32.xlu0 %v2380_v50 }
 0x23e   :  { %v2383_v51 = vpop.f32.mrb[36].mxu1 }
 0x23f   :  { %769 = vst [vmem:[%s2979_s4 + $0xa8] sm:$0xff] %v2383_v51  ;;  %v2389_v52 = vpop.f32.mrb[37].mxu1  ;;  %v2394_v53 = vsel %vm782_vm0, %v2383_v51, -inf }
 0x240   :  { %768 = vst [vmem:[%s2979_s4 + $0xa0] sm:$0xff] %v2389_v52  ;;  %857 = vmax.xlane.f32.xlu1 %v2394_v53  ;;  %v2404_v54 = vsel %vm782_vm0, %v2389_v52, -inf }
 0x241   :  { %855 = vmax.xlane.f32.xlu0 %v2404_v54 }
 0x246   :  { %v2407_v55 = vpop.f32.mrb[38].mxu1 }
 0x247   :  { %771 = vst [vmem:[%s2979_s4 + $0xb8] sm:$0xff] %v2407_v55  ;;  %v2413_v56 = vpop.f32.mrb[39].mxu1  ;;  %v2418_v57 = vsel %vm782_vm0, %v2407_v55, -inf }
 0x248   :  { %770 = vst [vmem:[%s2979_s4 + $0xb0] sm:$0xff] %v2413_v56  ;;  %861 = vmax.xlane.f32.xlu1 %v2418_v57  ;;  %v2428_v58 = vsel %vm782_vm0, %v2413_v56, -inf }
 0x249   :  { %859 = vmax.xlane.f32.xlu0 %v2428_v58 }
 0x24a   :  { %v2431_v59 = vpop.f32.mrb[40].mxu1 }
 0x24b   :  { %773 = vst [vmem:[%s2979_s4 + $0xc8] sm:$0xff] %v2431_v59  ;;  %v2437_v60 = vpop.f32.mrb[41].mxu1  ;;  %v2442_v61 = vsel %vm782_vm0, %v2431_v59, -inf }
 0x24c   :  { %3007 = vst [vmem:[#allocation2_spill] sm:$0xff] %v2437_v60  ;;  %772 = vst [vmem:[%s2979_s4 + $0xc0] sm:$0xff] %v2437_v60  ;;  %865 = vmax.xlane.f32.xlu1 %v2442_v61  ;;  %v2452_v62 = vsel %vm782_vm0, %v2437_v60, -inf }
 0x24d   :  { %863 = vmax.xlane.f32.xlu0 %v2452_v62 }
 0x24e   :  { %v2455_v63 = vpop.f32.mrb[42].mxu1 }
 0x24f   :  { %3008 = vst [vmem:[#allocation3_spill] sm:$0xff] %v2455_v63  ;;  %775 = vst [vmem:[%s2979_s4 + $0xd8] sm:$0xff] %v2455_v63  ;;  %v2461_v0 = vpop.f32.mrb[43].mxu1  ;;  %v2466_v1 = vsel %vm782_vm0, %v2455_v63, -inf }
 0x250   :  { %3009 = vst [vmem:[#allocation4_spill] sm:$0xff] %v2461_v0  ;;  %774 = vst [vmem:[%s2979_s4 + $0xd0] sm:$0xff] %v2461_v0  ;;  %869 = vmax.xlane.f32.xlu1 %v2466_v1  ;;  %v2476_v2 = vsel %vm782_vm0, %v2461_v0, -inf }
 0x251   :  { %3010 = vst [vmem:[#allocation5_spill] sm:$0xff] %v2476_v2  ;;  %867 = vmax.xlane.f32.xlu0 %v2476_v2 }
 0x252   :  { %v2479_v3 = vpop.f32.mrb[44].mxu1 }
 0x253   :  { %3011 = vst [vmem:[#allocation6_spill] sm:$0xff] %v2479_v3  ;;  %777 = vst [vmem:[%s2979_s4 + $0xe8] sm:$0xff] %v2479_v3  ;;  %v2485_v4 = vpop.f32.mrb[45].mxu1  ;;  %v2490_v5 = vsel %vm782_vm0, %v2479_v3, -inf }
 0x254   :  { %3012 = vst [vmem:[#allocation7_spill] sm:$0xff] %v2485_v4  ;;  %3013 = vst [vmem:[#allocation8_spill] sm:$0xff] %v2490_v5  ;;  %873 = vmax.xlane.f32.xlu1 %v2490_v5  ;;  %v2500_v6 = vsel %vm782_vm0, %v2485_v4, -inf }
 0x255   :  { %776 = vst [vmem:[%s2979_s4 + $0xe0] sm:$0xff] %v2485_v4  ;;  %3014 = vst [vmem:[#allocation9_spill] sm:$0xff] %v2500_v6  ;;  %871 = vmax.xlane.f32.xlu0 %v2500_v6 }
 0x256   :  { %v2503_v7 = vpop.f32.mrb[46].mxu1 }
 0x257   :  { %3015 = vst [vmem:[#allocation10_spill] sm:$0xff] %v2503_v7  ;;  %779 = vst [vmem:[%s2979_s4 + $0xf8] sm:$0xff] %v2503_v7  ;;  %v2509_v8 = vpop.f32.mrb[47].mxu1  ;;  %v2514_v9 = vsel %vm782_vm0, %v2503_v7, -inf }
 0x258   :  { %3016 = vst [vmem:[#allocation11_spill] sm:$0xff] %v2509_v8  ;;  %3017 = vst [vmem:[#allocation12_spill] sm:$0xff] %v2514_v9  ;;  %877 = vmax.xlane.f32.xlu1 %v2514_v9  ;;  %v2524_v4 = vsel %vm782_vm0, %v2509_v8, -inf }
 0x259   :  { %778 = vst [vmem:[%s2979_s4 + $0xf0] sm:$0xff] %v2509_v8  ;;  %3018 = vst [vmem:[#allocation13_spill] sm:$0xff] %v2524_v4  ;;  %875 = vmax.xlane.f32.xlu0 %v2524_v4 }
 0x25f   :  { %v3034_v63 = vld [vmem:[#allocation12_spill] sm:$0xff] }
 0x27d   :  { %v2527_v6 = vpop.xlane.xlu0 %817 }
 0x27e   :  { %3019 = vst [vmem:[#allocation14_spill] sm:$0xff] %v2527_v6  ;;  %v880_v7 = vsub.f32 %v2154_v13, %v2527_v6 }
 0x280   :  { %v913_v5 = vmul.f32 1.442695, %v880_v7 }
 0x281   :  { %v2533_v0 = vpop.xlane.xlu0 %815 }
 0x282   :  { %3020 = vst [vmem:[#allocation15_spill] sm:$0xff] %v2533_v0  ;;  %1485 = vpow2.f32 %v913_v5  ;;  %v879_v9 = vsub.f32 %v2164_v14, %v2533_v0 }
 0x284   :  { %v911_v2 = vmul.f32 1.442695, %v879_v9 }
 0x285   :  { %v2539_v4 = vpop.xlane.xlu1 %821 }
 0x286   :  { %1487 = vpow2.f32 %v911_v2  ;;  %v882_v13 = vsub.f32 %v2178_v17, %v2539_v4 }
 0x288   :  { %v917_v7 = vmul.f32 1.442695, %v882_v13 }
 0x289   :  { %v2545_v6 = vpop.xlane.xlu1 %819 }
 0x28a   :  { %3021 = vst [vmem:[#allocation16_spill] sm:$0xff] %v2545_v6  ;;  %1489 = vpow2.f32 %v917_v7  ;;  %v881_v14 = vsub.f32 %v2188_v18, %v2545_v6 }
 0x28c   :  { %v1486_v9 = vpop.eup %1485  ;;  %v915_v8 = vmul.f32 1.442695, %v881_v14 }
 0x28d   :  { %v2551_v0 = vpop.xlane.xlu1 %825  ;;  %v976_v17 = vsel %vm782_vm0, %v1486_v9, 0.0 }
 0x28e   :  { %1491 = vpow2.f32 %v915_v8  ;;  %v884_v2 = vsub.f32 %v2202_v21, %v2551_v0  ;;  %v2559_v7 = vpop.xlane.xlu0 %823  ;;  %1009 = vadd.xlane.f32.xlu1 %v976_v17 }
 0x28f   :  { %v883_v18 = vsub.f32 %v2212_v22, %v2559_v7 }
 0x290   :  { %v1488_v5 = vpop.eup %1487  ;;  %v921_v3 = vmul.f32 1.442695, %v884_v2 }
 0x291   :  { %v919_v6 = vmul.f32 1.442695, %v883_v18  ;;  %v975_v8 = vsel %vm782_vm0, %v1488_v5, 0.0 }
 0x292   :  { %1493 = vpow2.f32 %v921_v3  ;;  %1007 = vadd.xlane.f32.xlu0 %v975_v8 }
 0x293   :  { %1495 = vpow2.f32 %v919_v6 }
 0x294   :  { %v1490_v21 = vpop.eup %1489 }
 0x295   :  { %v2567_v9 = vpop.xlane.xlu1 %829  ;;  %v978_v17 = vsel %vm782_vm0, %v1490_v21, 0.0 }
 0x296   :  { %v886_v22 = vsub.f32 %v2226_v25, %v2567_v9  ;;  %v2575_v2 = vpop.xlane.xlu0 %827  ;;  %1013 = vadd.xlane.f32.xlu1 %v978_v17 }
 0x297   :  { %v885_v3 = vsub.f32 %v2236_v26, %v2575_v2 }
 0x298   :  { %v1492_v5 = vpop.eup %1491  ;;  %v925_v18 = vmul.f32 1.442695, %v886_v22 }
 0x299   :  { %v923_v8 = vmul.f32 1.442695, %v885_v3  ;;  %v977_v21 = vsel %vm782_vm0, %v1492_v5, 0.0 }
 0x29a   :  { %1497 = vpow2.f32 %v925_v18  ;;  %1011 = vadd.xlane.f32.xlu0 %v977_v21 }
 0x29b   :  { %1499 = vpow2.f32 %v923_v8 }
 0x29c   :  { %v1494_v25 = vpop.eup %1493 }
 0x29d   :  { %v1496_v14 = vpop.eup %1495  ;;  %v2583_v13 = vpop.xlane.xlu1 %833  ;;  %v980_v17 = vsel %vm782_vm0, %v1494_v25, 0.0 }
 0x29e   :  { %3022 = vst [vmem:[#allocation17_spill] sm:$0xff] %v2583_v13  ;;  %v888_v26 = vsub.f32 %v2250_v29, %v2583_v13  ;;  %v2591_v3 = vpop.xlane.xlu0 %831  ;;  %1017 = vadd.xlane.f32.xlu1 %v980_v17  ;;  %v979_v5 = vsel %vm782_vm0, %v1496_v14, 0.0 }
 0x29f   :  { %v887_v18 = vsub.f32 %v2260_v30, %v2591_v3  ;;  %1015 = vadd.xlane.f32.xlu0 %v979_v5 }
 0x2a0   :  { %v929_v21 = vmul.f32 1.442695, %v888_v26 }
 0x2a1   :  { %v927_v25 = vmul.f32 1.442695, %v887_v18 }
 0x2a2   :  { %1501 = vpow2.f32 %v929_v21 }
 0x2a3   :  { %1503 = vpow2.f32 %v927_v25 }
 0x2a4   :  { %v1498_v29 = vpop.eup %1497 }
 0x2a5   :  { %v1500_v6 = vpop.eup %1499  ;;  %v2599_v22 = vpop.xlane.xlu1 %837  ;;  %v982_v17 = vsel %vm782_vm0, %v1498_v29, 0.0 }
 0x2a6   :  { %v890_v14 = vsub.f32 %v2274_v33, %v2599_v22  ;;  %v2607_v13 = vpop.xlane.xlu0 %835  ;;  %1021 = vadd.xlane.f32.xlu1 %v982_v17  ;;  %v981_v26 = vsel %vm782_vm0, %v1500_v6, 0.0 }
 0x2a7   :  { %v889_v5 = vsub.f32 %v2284_v34, %v2607_v13  ;;  %1019 = vadd.xlane.f32.xlu0 %v981_v26 }
 0x2a8   :  { %v933_v21 = vmul.f32 1.442695, %v890_v14 }
 0x2a9   :  { %v931_v25 = vmul.f32 1.442695, %v889_v5 }
 0x2aa   :  { %1505 = vpow2.f32 %v933_v21 }
 0x2ab   :  { %1507 = vpow2.f32 %v931_v25 }
 0x2ac   :  { %v1502_v33 = vpop.eup %1501 }
 0x2ad   :  { %v1504_v29 = vpop.eup %1503  ;;  %v2615_v30 = vpop.xlane.xlu1 %841  ;;  %v984_v17 = vsel %vm782_vm0, %v1502_v33, 0.0 }
 0x2ae   :  { %v892_v6 = vsub.f32 %v2298_v37, %v2615_v30  ;;  %v2623_v8 = vpop.xlane.xlu0 %839  ;;  %1025 = vadd.xlane.f32.xlu1 %v984_v17  ;;  %v983_v14 = vsel %vm782_vm0, %v1504_v29, 0.0 }
 0x2af   :  { %v891_v26 = vsub.f32 %v2308_v38, %v2623_v8  ;;  %1023 = vadd.xlane.f32.xlu0 %v983_v14 }
 0x2b0   :  { %v937_v21 = vmul.f32 1.442695, %v892_v6 }
 0x2b1   :  { %v935_v25 = vmul.f32 1.442695, %v891_v26 }
 0x2b2   :  { %1509 = vpow2.f32 %v937_v21 }
 0x2b3   :  { %1511 = vpow2.f32 %v935_v25 }
 0x2b4   :  { %v1506_v37 = vpop.eup %1505 }
 0x2b5   :  { %v1508_v33 = vpop.eup %1507  ;;  %v2631_v34 = vpop.xlane.xlu1 %845  ;;  %v986_v17 = vsel %vm782_vm0, %v1506_v37, 0.0 }
 0x2b6   :  { %v894_v29 = vsub.f32 %v2322_v41, %v2631_v34  ;;  %v2639_v18 = vpop.xlane.xlu0 %843  ;;  %1029 = vadd.xlane.f32.xlu1 %v986_v17  ;;  %v985_v6 = vsel %vm782_vm0, %v1508_v33, 0.0 }
 0x2b7   :  { %v893_v14 = vsub.f32 %v2332_v42, %v2639_v18  ;;  %1027 = vadd.xlane.f32.xlu0 %v985_v6 }
 0x2b8   :  { %v941_v21 = vmul.f32 1.442695, %v894_v29 }
 0x2b9   :  { %v939_v25 = vmul.f32 1.442695, %v893_v14 }
 0x2ba   :  { %1513 = vpow2.f32 %v941_v21 }
 0x2bb   :  { %1515 = vpow2.f32 %v939_v25 }
 0x2bc   :  { %v1510_v41 = vpop.eup %1509 }
 0x2bd   :  { %v1512_v37 = vpop.eup %1511  ;;  %v2647_v38 = vpop.xlane.xlu1 %849  ;;  %v988_v17 = vsel %vm782_vm0, %v1510_v41, 0.0 }
 0x2be   :  { %v896_v33 = vsub.f32 %v2346_v45, %v2647_v38  ;;  %v2655_v5 = vpop.xlane.xlu0 %847  ;;  %1033 = vadd.xlane.f32.xlu1 %v988_v17  ;;  %v987_v29 = vsel %vm782_vm0, %v1512_v37, 0.0 }
 0x2bf   :  { %v895_v6 = vsub.f32 %v2356_v46, %v2655_v5  ;;  %1031 = vadd.xlane.f32.xlu0 %v987_v29 }
 0x2c0   :  { %v945_v21 = vmul.f32 1.442695, %v896_v33 }
 0x2c1   :  { %v943_v25 = vmul.f32 1.442695, %v895_v6 }
 0x2c2   :  { %1517 = vpow2.f32 %v945_v21 }
 0x2c3   :  { %1519 = vpow2.f32 %v943_v25 }
 0x2c4   :  { %v1514_v45 = vpop.eup %1513 }
 0x2c5   :  { %v1516_v41 = vpop.eup %1515  ;;  %v2663_v42 = vpop.xlane.xlu1 %853  ;;  %v990_v17 = vsel %vm782_vm0, %v1514_v45, 0.0 }
 0x2c6   :  { %v898_v37 = vsub.f32 %v2370_v49, %v2663_v42  ;;  %v2671_v26 = vpop.xlane.xlu0 %851  ;;  %1037 = vadd.xlane.f32.xlu1 %v990_v17  ;;  %v989_v33 = vsel %vm782_vm0, %v1516_v41, 0.0 }
 0x2c7   :  { %v897_v29 = vsub.f32 %v2380_v50, %v2671_v26  ;;  %1035 = vadd.xlane.f32.xlu0 %v989_v33 }
 0x2c8   :  { %v949_v21 = vmul.f32 1.442695, %v898_v37 }
 0x2c9   :  { %v947_v25 = vmul.f32 1.442695, %v897_v29 }
 0x2ca   :  { %1521 = vpow2.f32 %v949_v21 }
 0x2cb   :  { %1523 = vpow2.f32 %v947_v25 }
 0x2cc   :  { %v1518_v49 = vpop.eup %1517 }
 0x2cd   :  { %v1520_v45 = vpop.eup %1519  ;;  %v2679_v46 = vpop.xlane.xlu1 %857  ;;  %v992_v17 = vsel %vm782_vm0, %v1518_v49, 0.0 }
 0x2ce   :  { %v900_v41 = vsub.f32 %v2394_v53, %v2679_v46  ;;  %v2687_v14 = vpop.xlane.xlu0 %855  ;;  %1041 = vadd.xlane.f32.xlu1 %v992_v17  ;;  %v991_v37 = vsel %vm782_vm0, %v1520_v45, 0.0 }
 0x2cf   :  { %v899_v33 = vsub.f32 %v2404_v54, %v2687_v14  ;;  %1039 = vadd.xlane.f32.xlu0 %v991_v37 }
 0x2d0   :  { %v953_v21 = vmul.f32 1.442695, %v900_v41 }
 0x2d1   :  { %v951_v25 = vmul.f32 1.442695, %v899_v33 }
 0x2d2   :  { %1525 = vpow2.f32 %v953_v21 }
 0x2d3   :  { %1527 = vpow2.f32 %v951_v25 }
 0x2d4   :  { %v1522_v53 = vpop.eup %1521 }
 0x2d5   :  { %v1524_v49 = vpop.eup %1523  ;;  %v2695_v50 = vpop.xlane.xlu1 %861  ;;  %v994_v17 = vsel %vm782_vm0, %v1522_v53, 0.0 }
 0x2d6   :  { %v902_v45 = vsub.f32 %v2418_v57, %v2695_v50  ;;  %v2703_v6 = vpop.xlane.xlu0 %859  ;;  %1045 = vadd.xlane.f32.xlu1 %v994_v17  ;;  %v993_v41 = vsel %vm782_vm0, %v1524_v49, 0.0 }
 0x2d7   :  { %v901_v37 = vsub.f32 %v2428_v58, %v2703_v6  ;;  %1043 = vadd.xlane.f32.xlu0 %v993_v41 }
 0x2d8   :  { %v957_v21 = vmul.f32 1.442695, %v902_v45 }
 0x2d9   :  { %v955_v25 = vmul.f32 1.442695, %v901_v37  ;;  %v2711_v53 = vpop.xlane.xlu1 %865 }
 0x2da   :  { %1529 = vpow2.f32 %v957_v21  ;;  %v904_v57 = vsub.f32 %v2442_v61, %v2711_v53  ;;  %v2717_v54 = vpop.xlane.xlu0 %863 }
 0x2db   :  { %3023 = vst [vmem:[#allocation18_spill] sm:$0xff] %v2717_v54  ;;  %1531 = vpow2.f32 %v955_v25  ;;  %v903_v58 = vsub.f32 %v2452_v62, %v2717_v54  ;;  %v3029_v25 = vld [vmem:[#allocation8_spill] sm:$0xff] }
 0x2dc   :  { %v1526_v45 = vpop.eup %1525  ;;  %v961_v41 = vmul.f32 1.442695, %v904_v57 }
 0x2dd   :  { %v1528_v37 = vpop.eup %1527  ;;  %v959_v33 = vmul.f32 1.442695, %v903_v58  ;;  %v2723_v21 = vpop.xlane.xlu1 %869  ;;  %v996_v61 = vsel %vm782_vm0, %v1526_v45, 0.0  ;;  %v3026_v58 = vld [vmem:[#allocation5_spill] sm:$0xff] }
 0x2de   :  { %3024 = vst [vmem:[#allocation19_spill] sm:$0xff] %v2723_v21  ;;  %1533 = vpow2.f32 %v961_v41  ;;  %v906_v17 = vsub.f32 %v2466_v1, %v2723_v21  ;;  %v2731_v62 = vpop.xlane.xlu0 %867  ;;  %1049 = vadd.xlane.f32.xlu1 %v996_v61  ;;  %v995_v57 = vsel %vm782_vm0, %v1528_v37, 0.0 }
 0x2df   :  { %3025 = vst [vmem:[#allocation20_spill] sm:$0xff] %v2731_v62  ;;  %1535 = vpow2.f32 %v959_v33  ;;  %v905_v49 = vsub.f32 %v3026_v58, %v2731_v62  ;;  %1047 = vadd.xlane.f32.xlu0 %v995_v57  ;;  %v3032_v33 = vld [vmem:[#allocation9_spill] sm:$0xff] }
 0x2e0   :  { %v965_v41 = vmul.f32 1.442695, %v906_v17 }
 0x2e1   :  { %v963_v54 = vmul.f32 1.442695, %v905_v49  ;;  %v2739_v1 = vpop.xlane.xlu1 %873 }
 0x2e2   :  { %3028 = vst [vmem:[#allocation5_spill] sm:$0xff] %v2739_v1  ;;  %1537 = vpow2.f32 %v965_v41  ;;  %v908_v21 = vsub.f32 %v3029_v25, %v2739_v1  ;;  %v2745_v37 = vpop.xlane.xlu0 %871 }
 0x2e3   :  { %3031 = vst [vmem:[#allocation8_spill] sm:$0xff] %v2745_v37  ;;  %1539 = vpow2.f32 %v963_v54  ;;  %v907_v58 = vsub.f32 %v3032_v33, %v2745_v37  ;;  %v3035_v54 = vld [vmem:[#allocation10_spill] sm:$0xff]  ;;  %v3037_v37 = vld [vmem:[#allocation11_spill] sm:$0xff] }
 0x2e4   :  { %v1530_v17 = vpop.eup %1529  ;;  %v969_v49 = vmul.f32 1.442695, %v908_v21 }
 0x2e5   :  { %v1532_v62 = vpop.eup %1531  ;;  %v967_v29 = vmul.f32 1.442695, %v907_v58  ;;  %v2751_v41 = vpop.xlane.xlu1 %877  ;;  %v998_v25 = vsel %vm782_vm0, %v1530_v17, 0.0  ;;  %v3036_v58 = vld [vmem:[#allocation13_spill] sm:$0xff] }
 0x2e6   :  { %1541 = vpow2.f32 %v969_v49  ;;  %v910_v1 = vsub.f32 %v3034_v63, %v2751_v41  ;;  %1053 = vadd.xlane.f32.xlu1 %v998_v25  ;;  %v2759_v33 = vpop.xlane.xlu0 %875  ;;  %v997_v21 = vsel %vm782_vm0, %v1532_v62, 0.0 }
 0x2e7   :  { %1543 = vpow2.f32 %v967_v29  ;;  %v909_v57 = vsub.f32 %v3036_v58, %v2759_v33  ;;  %1051 = vadd.xlane.f32.xlu0 %v997_v21 }
 0x2e8   :  { %v1534_v49 = vpop.eup %1533  ;;  %v973_v45 = vmul.f32 1.442695, %v910_v1 }
 0x2e9   :  { %v1536_v63 = vpop.eup %1535  ;;  %v971_v60 = vmul.f32 1.442695, %v909_v57  ;;  %v1000_v25 = vsel %vm782_vm0, %v1534_v49, 0.0 }
 0x2ea   :  { %1545 = vpow2.f32 %v973_v45  ;;  %1057 = vadd.xlane.f32.xlu1 %v1000_v25  ;;  %v999_v62 = vsel %vm782_vm0, %v1536_v63, 0.0 }
 0x2eb   :  { %1547 = vpow2.f32 %v971_v60  ;;  %1055 = vadd.xlane.f32.xlu0 %v999_v62 }
 0x2ec   :  { %v1538_v29 = vpop.eup %1537 }
 0x2ed   :  { %v1540_v58 = vpop.eup %1539  ;;  %v1002_v17 = vsel %vm782_vm0, %v1538_v29, 0.0 }
 0x2ee   :  { %1061 = vadd.xlane.f32.xlu1 %v1002_v17  ;;  %v1001_v1 = vsel %vm782_vm0, %v1540_v58, 0.0 }
 0x2ef   :  { %1059 = vadd.xlane.f32.xlu0 %v1001_v1 }
 0x2f0   :  { %v1542_v57 = vpop.eup %1541 }
 0x2f1   :  { %v1544_v21 = vpop.eup %1543  ;;  %v1004_v45 = vsel %vm782_vm0, %v1542_v57, 0.0 }
 0x2f2   :  { %1065 = vadd.xlane.f32.xlu1 %v1004_v45  ;;  %v1003_v60 = vsel %vm782_vm0, %v1544_v21, 0.0  ;;  %v3038_v45 = vld [vmem:[#allocation14_spill] sm:$0xff] }
 0x2f3   :  { %1063 = vadd.xlane.f32.xlu0 %v1003_v60  ;;  %v3039_v60 = vsub.f32 %v2143_v11, %v3038_v45 }
 0x2f4   :  { %v1546_v49 = vpop.eup %1545 }
 0x2f5   :  { %v1548_v63 = vpop.eup %1547  ;;  %v1006_v25 = vsel %vm782_vm0, %v1546_v49, 0.0 }
 0x2f6   :  { %1069 = vadd.xlane.f32.xlu1 %v1006_v25  ;;  %v1005_v17 = vsel %vm782_vm0, %v1548_v63, 0.0 }
 0x2f7   :  { %1067 = vadd.xlane.f32.xlu0 %v1005_v17  ;;  %v3040_v17 = vld [vmem:[#allocation15_spill] sm:$0xff] }
 0x31b   :  { %v1010_v62 = vpop.xlane.xlu1 %1009 }
 0x31c   :  { %1549 = vlog2.f32 %v1010_v62  ;;  %v3041_v62 = vsub.f32 %v2149_v12, %v3040_v17  ;;  %v3045_v17 = vsub.f32 %v2191_v19, %v2551_v0 }
 0x31f   :  { %v1008_v29 = vpop.xlane.xlu0 %1007 }
 0x320   :  { %1551 = vlog2.f32 %v1008_v29 }
 0x323   :  { %v1014_v58 = vpop.xlane.xlu1 %1013 }
 0x324   :  { %1553 = vlog2.f32 %v1014_v58 }
 0x326   :  { %v1550_v1 = vpop.eup %1549 }
 0x327   :  { %v1074_v57 = vmul.f32 0.6931472, %v1550_v1  ;;  %v1012_v21 = vpop.xlane.xlu0 %1011  ;;  %v3042_v1 = vsub.f32 %v2167_v15, %v2539_v4 }
 0x328   :  { %1555 = vlog2.f32 %v1012_v21 }
 0x329   :  { %v1168_v61 = vsub.f32 %v3039_v60, %v1074_v57  ;;  %v3043_v60 = vld [vmem:[#allocation16_spill] sm:$0xff] }
 0x32a   :  { %v1552_v49 = vpop.eup %1551 }
 0x32b   :  { %1200 = vst [vmem:[%s2980_s5 + $0x8] sm:$0xff] %v1168_v61  ;;  %v1072_v10 = vmul.f32 0.6931472, %v1552_v49  ;;  %v1018_v63 = vpop.xlane.xlu1 %1017  ;;  %v3044_v49 = vsub.f32 %v2173_v16, %v3043_v60 }
 0x32c   :  { %1557 = vlog2.f32 %v1018_v63  ;;  %v1016_v25 = vpop.xlane.xlu0 %1015 }
 0x32d   :  { %v1167_v29 = vsub.f32 %v3041_v62, %v1072_v10  ;;  %1559 = vlog2.f32 %v1016_v25 }
 0x32e   :  { %v1554_v58 = vpop.eup %1553 }
 0x32f   :  { %1199 = vst [vmem:[%s2980_s5] sm:$0xff] %v1167_v29  ;;  %v1078_v11 = vmul.f32 0.6931472, %v1554_v58  ;;  %v3046_v29 = vsub.f32 %v2197_v20, %v2559_v7  ;;  %v3047_v20 = vsub.f32 %v2215_v23, %v2567_v9 }
 0x331   :  { %v1170_v57 = vsub.f32 %v3042_v1, %v1078_v11 }
 0x332   :  { %v1556_v61 = vpop.eup %1555 }
 0x333   :  { %1202 = vst [vmem:[%s2980_s5 + $0x18] sm:$0xff] %v1170_v57  ;;  %v1076_v21 = vmul.f32 0.6931472, %v1556_v61  ;;  %v1022_v45 = vpop.xlane.xlu1 %1021  ;;  %v3048_v61 = vsub.f32 %v2221_v24, %v2575_v2 }
 0x334   :  { %1561 = vlog2.f32 %v1022_v45  ;;  %v1020_v12 = vpop.xlane.xlu0 %1019 }
 0x335   :  { %v1169_v10 = vsub.f32 %v3044_v49, %v1076_v21  ;;  %1563 = vlog2.f32 %v1020_v12 }
 0x336   :  { %v1558_v63 = vpop.eup %1557 }
 0x337   :  { %v1560_v25 = vpop.eup %1559  ;;  %1201 = vst [vmem:[%s2980_s5 + $0x10] sm:$0xff] %v1169_v10  ;;  %v1082_v15 = vmul.f32 0.6931472, %v1558_v63  ;;  %v3049_v10 = vld [vmem:[#allocation17_spill] sm:$0xff]  ;;  %v3051_v63 = vsub.f32 %v2245_v28, %v2591_v3  ;;  %v3052_v28 = vsub.f32 %v2263_v31, %v2599_v22 }
 0x338   :  { %v1080_v4 = vmul.f32 0.6931472, %v1560_v25  ;;  %v3050_v24 = vsub.f32 %v2239_v27, %v3049_v10 }
 0x339   :  { %v1172_v62 = vsub.f32 %v3045_v17, %v1082_v15 }
 0x33a   :  { %v1171_v58 = vsub.f32 %v3046_v29, %v1080_v4 }
 0x33b   :  { %1204 = vst [vmem:[%s2980_s5 + $0x28] sm:$0xff] %v1172_v62  ;;  %v1026_v16 = vpop.xlane.xlu1 %1025 }
 0x33c   :  { %1203 = vst [vmem:[%s2980_s5 + $0x20] sm:$0xff] %v1171_v58  ;;  %1565 = vlog2.f32 %v1026_v16  ;;  %v1024_v11 = vpop.xlane.xlu0 %1023  ;;  %v3053_v58 = vsub.f32 %v2269_v32, %v2607_v13  ;;  %v3054_v32 = vsub.f32 %v2287_v35, %v2615_v30 }
 0x33d   :  { %1567 = vlog2.f32 %v1024_v11 }
 0x33e   :  { %v1562_v1 = vpop.eup %1561 }
 0x33f   :  { %v1564_v57 = vpop.eup %1563  ;;  %v1086_v19 = vmul.f32 0.6931472, %v1562_v1 }
 0x340   :  { %v1084_v0 = vmul.f32 0.6931472, %v1564_v57 }
 0x341   :  { %v1174_v7 = vsub.f32 %v3047_v20, %v1086_v19 }
 0x342   :  { %v1173_v21 = vsub.f32 %v3048_v61, %v1084_v0  ;;  %v3055_v0 = vsub.f32 %v2293_v36, %v2623_v8  ;;  %v3056_v36 = vsub.f32 %v2311_v39, %v2631_v34 }
 0x343   :  { %1206 = vst [vmem:[%s2980_s5 + $0x38] sm:$0xff] %v1174_v7  ;;  %v1030_v45 = vpop.xlane.xlu1 %1029 }
 0x344   :  { %1205 = vst [vmem:[%s2980_s5 + $0x30] sm:$0xff] %v1173_v21  ;;  %1569 = vlog2.f32 %v1030_v45  ;;  %v1028_v12 = vpop.xlane.xlu0 %1027 }
 0x345   :  { %1571 = vlog2.f32 %v1028_v12  ;;  %v3057_v12 = vsub.f32 %v2317_v40, %v2639_v18  ;;  %v3058_v40 = vsub.f32 %v2335_v43, %v2647_v38 }
 0x346   :  { %v1566_v60 = vpop.eup %1565 }
 0x347   :  { %v1568_v49 = vpop.eup %1567  ;;  %v1090_v23 = vmul.f32 0.6931472, %v1566_v60 }
 0x348   :  { %v1088_v9 = vmul.f32 0.6931472, %v1568_v49 }
 0x349   :  { %v1176_v2 = vsub.f32 %v3050_v24, %v1090_v23  ;;  %v3059_v24 = vsub.f32 %v2341_v44, %v2655_v5  ;;  %v3060_v44 = vsub.f32 %v2359_v47, %v2663_v42 }
 0x34a   :  { %v1175_v25 = vsub.f32 %v3051_v63, %v1088_v9 }
 0x34b   :  { %1208 = vst [vmem:[%s2980_s5 + $0x48] sm:$0xff] %v1176_v2  ;;  %v1034_v15 = vpop.xlane.xlu1 %1033 }
 0x34c   :  { %1207 = vst [vmem:[%s2980_s5 + $0x40] sm:$0xff] %v1175_v25  ;;  %1573 = vlog2.f32 %v1034_v15  ;;  %v1032_v4 = vpop.xlane.xlu0 %1031 }
 0x34d   :  { %1575 = vlog2.f32 %v1032_v4 }
 0x34e   :  { %v1570_v17 = vpop.eup %1569 }
 0x34f   :  { %v1572_v62 = vpop.eup %1571  ;;  %v1094_v27 = vmul.f32 0.6931472, %v1570_v17  ;;  %v3061_v17 = vsub.f32 %v2365_v48, %v2671_v26  ;;  %v3062_v26 = vsub.f32 %v2383_v51, %v2679_v46 }
 0x350   :  { %v1092_v29 = vmul.f32 0.6931472, %v1572_v62 }
 0x351   :  { %v1178_v3 = vsub.f32 %v3052_v28, %v1094_v27 }
 0x352   :  { %v1177_v16 = vsub.f32 %v3053_v58, %v1092_v29 }
 0x353   :  { %1210 = vst [vmem:[%s2980_s5 + $0x58] sm:$0xff] %v1178_v3  ;;  %v1038_v11 = vpop.xlane.xlu1 %1037 }
 0x354   :  { %1209 = vst [vmem:[%s2980_s5 + $0x50] sm:$0xff] %v1177_v16  ;;  %1577 = vlog2.f32 %v1038_v11  ;;  %v1036_v1 = vpop.xlane.xlu0 %1035  ;;  %v3063_v11 = vsub.f32 %v2389_v52, %v2687_v14  ;;  %v3064_v14 = vsub.f32 %v2407_v55, %v2695_v50  ;;  %v3066_v50 = vsub.f32 %v2431_v59, %v2711_v53  ;;  %v3071_v59 = vld [vmem:[#allocation19_spill] sm:$0xff] }
 0x355   :  { %1579 = vlog2.f32 %v1036_v1 }
 0x356   :  { %v1574_v57 = vpop.eup %1573 }
 0x357   :  { %v1576_v19 = vpop.eup %1575  ;;  %v1098_v31 = vmul.f32 0.6931472, %v1574_v57 }
 0x358   :  { %v1096_v22 = vmul.f32 0.6931472, %v1576_v19 }
 0x359   :  { %v1180_v13 = vsub.f32 %v3054_v32, %v1098_v31 }
 0x35a   :  { %v1179_v20 = vsub.f32 %v3055_v0, %v1096_v22 }
 0x35b   :  { %1212 = vst [vmem:[%s2980_s5 + $0x68] sm:$0xff] %v1180_v13  ;;  %v1042_v7 = vpop.xlane.xlu1 %1041 }
 0x35c   :  { %1211 = vst [vmem:[%s2980_s5 + $0x60] sm:$0xff] %v1179_v20  ;;  %1581 = vlog2.f32 %v1042_v7  ;;  %v1040_v61 = vpop.xlane.xlu0 %1039  ;;  %v3065_v20 = vsub.f32 %v2413_v56, %v2703_v6  ;;  %v3067_v6 = vld [vmem:[#allocation2_spill] sm:$0xff] }
 0x35d   :  { %1583 = vlog2.f32 %v1040_v61 }
 0x35e   :  { %v1578_v21 = vpop.eup %1577 }
 0x35f   :  { %v1580_v45 = vpop.eup %1579  ;;  %v1102_v35 = vmul.f32 0.6931472, %v1578_v21 }
 0x360   :  { %v1100_v30 = vmul.f32 0.6931472, %v1580_v45 }
 0x361   :  { %v1182_v8 = vsub.f32 %v3056_v36, %v1102_v35  ;;  %v3068_v36 = vld [vmem:[#allocation18_spill] sm:$0xff] }
 0x362   :  { %v1181_v60 = vsub.f32 %v3057_v12, %v1100_v30 }
 0x363   :  { %1214 = vst [vmem:[%s2980_s5 + $0x78] sm:$0xff] %v1182_v8  ;;  %v1046_v49 = vpop.xlane.xlu1 %1045  ;;  %v3069_v8 = vsub.f32 %v3067_v6, %v3068_v36 }
 0x364   :  { %1213 = vst [vmem:[%s2980_s5 + $0x70] sm:$0xff] %v1181_v60  ;;  %1585 = vlog2.f32 %v1046_v49  ;;  %v1044_v23 = vpop.xlane.xlu0 %1043 }
 0x365   :  { %1587 = vlog2.f32 %v1044_v23 }
 0x366   :  { %v1582_v9 = vpop.eup %1581 }
 0x367   :  { %v1584_v10 = vpop.eup %1583  ;;  %v1106_v39 = vmul.f32 0.6931472, %v1582_v9  ;;  %v3070_v9 = vld [vmem:[#allocation3_spill] sm:$0xff] }
 0x368   :  { %v1104_v34 = vmul.f32 0.6931472, %v1584_v10  ;;  %v3072_v53 = vsub.f32 %v3070_v9, %v3071_v59 }
 0x369   :  { %v1184_v18 = vsub.f32 %v3058_v40, %v1106_v39  ;;  %v3074_v40 = vld [vmem:[#allocation20_spill] sm:$0xff] }
 0x36a   :  { %v1183_v2 = vsub.f32 %v3059_v24, %v1104_v34  ;;  %v3073_v34 = vld [vmem:[#allocation4_spill] sm:$0xff] }
 0x36b   :  { %1216 = vst [vmem:[%s2980_s5 + $0x88] sm:$0xff] %v1184_v18  ;;  %v1050_v63 = vpop.xlane.xlu1 %1049  ;;  %v3075_v18 = vsub.f32 %v3073_v34, %v3074_v40 }
 0x36c   :  { %1215 = vst [vmem:[%s2980_s5 + $0x80] sm:$0xff] %v1183_v2  ;;  %1589 = vlog2.f32 %v1050_v63  ;;  %v1048_v25 = vpop.xlane.xlu0 %1047 }
 0x36d   :  { %1591 = vlog2.f32 %v1048_v25 }
 0x36e   :  { %v1586_v15 = vpop.eup %1585 }
 0x36f   :  { %v1588_v4 = vpop.eup %1587  ;;  %v1110_v43 = vmul.f32 0.6931472, %v1586_v15  ;;  %v3076_v15 = vld [vmem:[#allocation6_spill] sm:$0xff] }
 0x370   :  { %v1108_v38 = vmul.f32 0.6931472, %v1588_v4  ;;  %v3077_v4 = vld [vmem:[#allocation5_spill] sm:$0xff] }
 0x371   :  { %v1186_v5 = vsub.f32 %v3060_v44, %v1110_v43  ;;  %v3078_v43 = vsub.f32 %v3076_v15, %v3077_v4 }
 0x372   :  { %v1185_v62 = vsub.f32 %v3061_v17, %v1108_v38  ;;  %v3080_v17 = vld [vmem:[#allocation8_spill] sm:$0xff] }
 0x373   :  { %1218 = vst [vmem:[%s2980_s5 + $0x98] sm:$0xff] %v1186_v5  ;;  %v1054_v27 = vpop.xlane.xlu1 %1053  ;;  %v3079_v5 = vld [vmem:[#allocation7_spill] sm:$0xff] }
 0x374   :  { %1217 = vst [vmem:[%s2980_s5 + $0x90] sm:$0xff] %v1185_v62  ;;  %1593 = vlog2.f32 %v1054_v27  ;;  %v1052_v29 = vpop.xlane.xlu0 %1051  ;;  %v3081_v62 = vsub.f32 %v3079_v5, %v3080_v17 }
 0x375   :  { %1595 = vlog2.f32 %v1052_v29 }
 0x376   :  { %v1590_v28 = vpop.eup %1589 }
 0x377   :  { %v1592_v3 = vpop.eup %1591  ;;  %v1114_v47 = vmul.f32 0.6931472, %v1590_v28  ;;  %v1058_v42 = vpop.xlane.xlu1 %1057 }
 0x378   :  { %v1112_v58 = vmul.f32 0.6931472, %v1592_v3  ;;  %1597 = vlog2.f32 %v1058_v42  ;;  %v1056_v48 = vpop.xlane.xlu0 %1055 }
 0x379   :  { %v1188_v16 = vsub.f32 %v3062_v26, %v1114_v47  ;;  %1599 = vlog2.f32 %v1056_v48  ;;  %v3082_v47 = vsub.f32 %v3035_v54, %v2751_v41 }
 0x37a   :  { %v1187_v1 = vsub.f32 %v3063_v11, %v1112_v58  ;;  %v3083_v58 = vsub.f32 %v3037_v37, %v2759_v33 }
 0x37b   :  { %1220 = vst [vmem:[%s2980_s5 + $0xa8] sm:$0xff] %v1188_v16  ;;  %v1062_v57 = vpop.xlane.xlu1 %1061 }
 0x37c   :  { %1219 = vst [vmem:[%s2980_s5 + $0xa0] sm:$0xff] %v1187_v1  ;;  %1601 = vlog2.f32 %v1062_v57  ;;  %v1060_v19 = vpop.xlane.xlu0 %1059 }
 0x37d   :  { %1603 = vlog2.f32 %v1060_v19 }
 0x37e   :  { %v1594_v31 = vpop.eup %1593 }
 0x37f   :  { %v1596_v51 = vpop.eup %1595  ;;  %v1118_v46 = vmul.f32 0.6931472, %v1594_v31  ;;  %v1066_v22 = vpop.xlane.xlu1 %1065 }
 0x380   :  { %v1116_v32 = vmul.f32 0.6931472, %v1596_v51  ;;  %1605 = vlog2.f32 %v1066_v22  ;;  %v1064_v52 = vpop.xlane.xlu0 %1063 }
 0x381   :  { %v1190_v13 = vsub.f32 %v3064_v14, %v1118_v46  ;;  %1607 = vlog2.f32 %v1064_v52 }
 0x382   :  { %v1598_v0 = vpop.eup %1597  ;;  %v1189_v7 = vsub.f32 %v3065_v20, %v1116_v32 }
 0x383   :  { %v1600_v61 = vpop.eup %1599  ;;  %1222 = vst [vmem:[%s2980_s5 + $0xb8] sm:$0xff] %v1190_v13  ;;  %v1122_v21 = vmul.f32 0.6931472, %v1598_v0  ;;  %v1070_v45 = vpop.xlane.xlu1 %1069 }
 0x384   :  { %1221 = vst [vmem:[%s2980_s5 + $0xb0] sm:$0xff] %v1189_v7  ;;  %v1120_v35 = vmul.f32 0.6931472, %v1600_v61  ;;  %1609 = vlog2.f32 %v1070_v45  ;;  %v1068_v55 = vpop.xlane.xlu0 %1067 }
 0x385   :  { %v1192_v30 = vsub.f32 %v3066_v50, %v1122_v21  ;;  %1611 = vlog2.f32 %v1068_v55 }
 0x386   :  { %v1602_v56 = vpop.eup %1601  ;;  %v1191_v12 = vsub.f32 %v3069_v8, %v1120_v35 }
 0x387   :  { %v1604_v60 = vpop.eup %1603  ;;  %1224 = vst [vmem:[%s2980_s5 + $0xc8] sm:$0xff] %v1192_v30  ;;  %v1126_v49 = vmul.f32 0.6931472, %v1602_v56 }
 0x388   :  { %1223 = vst [vmem:[%s2980_s5 + $0xc0] sm:$0xff] %v1191_v12  ;;  %v1124_v23 = vmul.f32 0.6931472, %v1604_v60 }
 0x389   :  { %v1194_v10 = vsub.f32 %v3072_v53, %v1126_v49 }
 0x38a   :  { %v1606_v39 = vpop.eup %1605  ;;  %v1193_v24 = vsub.f32 %v3075_v18, %v1124_v23 }
 0x38b   :  { %v1608_v2 = vpop.eup %1607  ;;  %1226 = vst [vmem:[%s2980_s5 + $0xd8] sm:$0xff] %v1194_v10  ;;  %v1130_v63 = vmul.f32 0.6931472, %v1606_v39 }
 0x38c   :  { %1225 = vst [vmem:[%s2980_s5 + $0xd0] sm:$0xff] %v1193_v24  ;;  %v1128_v25 = vmul.f32 0.6931472, %v1608_v2 }
 0x38d   :  { %v1196_v38 = vsub.f32 %v3078_v43, %v1130_v63 }
 0x38e   :  { %v1610_v44 = vpop.eup %1609  ;;  %v1195_v27 = vsub.f32 %v3081_v62, %v1128_v25 }
 0x38f   :  { %v1612_v29 = vpop.eup %1611  ;;  %1228 = vst [vmem:[%s2980_s5 + $0xe8] sm:$0xff] %v1196_v38  ;;  %v1134_v28 = vmul.f32 0.6931472, %v1610_v44 }
 0x390   :  { %1227 = vst [vmem:[%s2980_s5 + $0xe0] sm:$0xff] %v1195_v27  ;;  %v1132_v3 = vmul.f32 0.6931472, %v1612_v29 }
 0x391   :  { %v1198_v42 = vsub.f32 %v3082_v47, %v1134_v28 }
 0x392   :  { %v1197_v48 = vsub.f32 %v3083_v58, %v1132_v3 }
 0x393   :  { %1230 = vst [vmem:[%s2980_s5 + $0xf8] sm:$0xff] %v1198_v42 }
 0x394   :  { %1229 = vst [vmem:[%s2980_s5 + $0xf0] sm:$0xff] %v1197_v48 }

</bundles_post_ra>
